<compile_context>
chip_gen: v6e
topology: v6e:2x2x1
jax: 0.10.0
libtpu: 0.0.40
codegen_flags: <defaults>
</compile_context>

<pallas_src>
import functools
import jax
import jax.numpy as jnp
from jax.experimental import pallas as pl
from jax.experimental.pallas import tpu as pltpu

EMBED_DIM = 32
N_HEADS = 4
FF_HID = 64
EPS = 1e-5  # nn.LayerNorm default


def _layer_norm(x, gamma, beta):
    mu = jnp.mean(x, axis=-1, keepdims=True)
    var = jnp.mean(jnp.square(x - mu), axis=-1, keepdims=True)
    return (x - mu) * jax.lax.rsqrt(var + EPS) * gamma + beta


# ---------------------------------------------------------------------------
# Kernel: full EncoderLayer for a (bt, S, D) batch tile
# ---------------------------------------------------------------------------
def _encoder_layer_kernel(src_ref, mask_ref,
                          wqkv_ref, bqkv_ref, wo_ref,
                          w1_ref, b1_ref, w2_ref,
                          vec_ref,
                          out_ref, *, n_heads):
    bt, S, D = src_ref.shape
    hd = D // n_heads

    # Packed small vectors: rows = [b_o, g1, beta1, g2, beta2, b_mlp2, pad, pad]
    bo, g1, beta1 = vec_ref[0:1, :], vec_ref[1:2, :], vec_ref[2:3, :]
    g2, beta2, b2 = vec_ref[3:4, :], vec_ref[4:5, :], vec_ref[5:6, :]

    x = src_ref[...]                       # (bt, S, D) f32
    xf = x.reshape(bt * S, D)              # flatten batch into MXU rows
    mask = mask_ref[...]                   # (bt, 1, S)

    # --- fused Q/K/V projection on the whole (bt*S, D) slab.
    #     1/sqrt(embed_dim) is pre-folded into the Q slice of wqkv/bqkv. ---
    qkv = jnp.dot(xf.astype(jnp.bfloat16), wqkv_ref[...],
                  preferred_element_type=jnp.float32) + bqkv_ref[...]
    qkv_bf = qkv.astype(jnp.bfloat16)      # single cast; sliced per batch/head below

    # --- multi-head attention (softmax is per batch element) ---
    ctx_rows = []
    for b in range(bt):                    # static unroll (bt = 2)
        # mask bias hoisted out of the head loop (masked_fill equivalent)
        bias = jnp.broadcast_to(jnp.where(mask[b] == 0.0, -1e20, 0.0), (S, S))
        qkv_b = qkv_bf[b * S:(b + 1) * S]  # (S, 3D) static sublane slice
        q = qkv_b[:, 0 * D:1 * D]
        k = qkv_b[:, 1 * D:2 * D]
        v = qkv_b[:, 2 * D:3 * D]
        head_ctx = []
        for h in range(n_heads):           # static unroll (n_heads = 4)
            qh = q[:, h * hd:(h + 1) * hd]
            kh = k[:, h * hd:(h + 1) * hd]
            vh = v[:, h * hd:(h + 1) * hd]
            e = jnp.dot(qh, kh.T, preferred_element_type=jnp.float32) + bias
            m = jnp.max(e, axis=-1, keepdims=True)
            p = jnp.exp(e - m)
            attn = p * pl.reciprocal(jnp.sum(p, axis=-1, keepdims=True), approx=True)
            # TODO(synk): dropout on attention weights omitted (eval / p=0 semantics)
            head_ctx.append(jnp.dot(attn.astype(jnp.bfloat16), vh,
                                    preferred_element_type=jnp.float32))   # (S, hd)
        ctx_rows.append(jnp.concatenate(head_ctx, axis=-1))                # (S, D)
    ctx = jnp.concatenate(ctx_rows, axis=0).astype(jnp.bfloat16)           # (bt*S, D)

    # --- single K=D output projection; bias + residual folded into one add ---
    attn_out = jnp.dot(ctx, wo_ref[...], preferred_element_type=jnp.float32) + bo + xf

    # --- residual + LayerNorm1 (dropout(src) == src at eval) ---
    h1 = _layer_norm(attn_out, g1, beta1)

    # --- MLP: Linear -> ReLU -> Linear ---
    ff = jnp.dot(h1.astype(jnp.bfloat16), w1_ref[...],
                 preferred_element_type=jnp.float32) + b1_ref[...]
    ff = jnp.maximum(ff, 0.0)
    mlp = jnp.dot(ff.astype(jnp.bfloat16), w2_ref[...],
                  preferred_element_type=jnp.float32) + b2

    # --- residual + LayerNorm2 ---
    out = _layer_norm(mlp + h1, g2, beta2)
    out_ref[...] = out.reshape(bt, S, D).astype(out_ref.dtype)


# ---------------------------------------------------------------------------
# Wrapper
# ---------------------------------------------------------------------------
def encoder_layer(src, mask, p, *, batch_tile=None):
    B, S, D = src.shape
    F = p["w1"].shape[1]
    # Default: whole batch in one grid step (best for single-TC v5e/v6e at this
    # size).  On v7x with larger B, pass batch_tile=B//2 so both TensorCores get
    # equal work via the "parallel" grid axis.
    bt = B if batch_tile is None else batch_tile
    assert B % bt == 0
    n_steps = B // bt

    def rep(shape):  # replicated (grid-invariant) operand
        nd = len(shape)
        return pl.BlockSpec(shape, lambda i, nd=nd: (0,) * nd)

    # Advisory cost hint so XLA schedules this tiny custom call sensibly.
    flops = int(2 * B * S * D * 3 * D        # fused QKV projection
                + 4 * B * S * S * D          # attention scores + context
                + 2 * B * S * D * D          # output projection
                + 4 * B * S * D * F)         # MLP (two linears)
    transcendentals = int(B * N_HEADS * S * S + B * N_HEADS * S + 2 * B * S)
    bytes_accessed = int(
        src.size * 4 + mask.size * 4 + B * S * D * 4          # activations in/out
        + (D * 3 * D + D * D + D * F + F * D) * 2              # bf16 weights
        + 3 * D * 4 + F * 4 + 8 * D * 4)                       # f32 biases / vecs

    kernel = functools.partial(_encoder_layer_kernel, n_heads=N_HEADS)
    return pl.pallas_call(
        kernel,
        out_shape=jax.ShapeDtypeStruct((B, S, D), jnp.float32),
        grid=(n_steps,),
        in_specs=[pl.BlockSpec((bt, S, D), lambda i: (i, 0, 0)),   # src
                  pl.BlockSpec((bt, 1, S), lambda i: (i, 0, 0)),   # mask
                  rep((D, 3 * D)), rep((1, 3 * D)),                # fused QKV W, b
                  rep((D, D)),                                     # W_o
                  rep((D, F)), rep((1, F)),                        # MLP W1, b1
                  rep((F, D)),                                     # MLP W2
                  rep((8, D))],                                    # packed vectors
        out_specs=pl.BlockSpec((bt, S, D), lambda i: (i, 0, 0)),
        compiler_params=pltpu.CompilerParams(dimension_semantics=("parallel",)),
        cost_estimate=pl.CostEstimate(flops=flops,
                                      transcendentals=transcendentals,
                                      bytes_accessed=bytes_accessed),
    )(src, mask, p["w_qkv"], p["b_qkv"], p["wo"],
      p["w1"], p["b1"], p["w2"], p["vecs"])


# ---------------------------------------------------------------------------
# Pure-JAX reference (f32) for validation.
# NOTE: 1/sqrt(embed_dim) (the model's `scale = embed_dim ** 0.5`) is folded into
# the Q slice of p["w_qkv"] / p["b_qkv"], so no explicit score scaling appears.
# ---------------------------------------------------------------------------
def reference_forward(src, mask, p):
    B, S, D = src.shape
    H, hd = N_HEADS, D // N_HEADS
    wqkv = p["w_qkv"].astype(jnp.float32)
    wo = p["wo"].astype(jnp.float32)
    w1 = p["w1"].astype(jnp.float32)
    w2 = p["w2"].astype(jnp.float32)
    bo, g1, beta1 = p["vecs"][0:1], p["vecs"][1:2], p["vecs"][2:3]
    g2, beta2, b2 = p["vecs"][3:4], p["vecs"][4:5], p["vecs"][5:6]

    qkv = src @ wqkv + p["b_qkv"]
    q, k, v = jnp.split(qkv, 3, axis=-1)
    qh = q.reshape(B, S, H, hd).transpose(0, 2, 1, 3)
    kh = k.reshape(B, S, H, hd).transpose(0, 2, 1, 3)
    vh = v.reshape(B, S, H, hd).transpose(0, 2, 1, 3)
    e = jnp.einsum("bhqd,bhkd->bhqk", qh, kh)
    e = jnp.where(mask[:, :, None, :] == 0.0, -1e20, e)
    attn = jax.nn.softmax(e, axis=-1)
    ctx = jnp.einsum("bhqk,bhkd->bhqd", attn, vh)
    ctx = ctx.transpose(0, 2, 1, 3).reshape(B, S, D)
    attn_out = ctx @ wo + bo

    h1 = _layer_norm(attn_out + src, g1, beta1)
    ff = jnp.maximum(h1 @ w1 + p["b1"], 0.0)
    mlp = ff @ w2 + b2
    return _layer_norm(mlp + h1, g2, beta2)


# ---------------------------------------------------------------------------
# Deterministic synthetic parameters
# ---------------------------------------------------------------------------
def init_params(key):
    ks = jax.random.split(key, 6)

    def lin(k, din, dout):
        kw, kb = jax.random.split(k)
        w = jax.random.normal(kw, (din, dout), jnp.float32) / jnp.sqrt(float(din))
        b = jax.random.normal(kb, (1, dout), jnp.float32) * 0.01
        return w, b

    wq, bq = lin(ks[0], EMBED_DIM, EMBED_DIM)
    wk, bk = lin(ks[1], EMBED_DIM, EMBED_DIM)
    wv, bv = lin(ks[2], EMBED_DIM, EMBED_DIM)
    wo, bo = lin(ks[3], EMBED_DIM, EMBED_DIM)
    w1, b1 = lin(ks[4], EMBED_DIM, FF_HID)
    w2, b2 = lin(ks[5], FF_HID, EMBED_DIM)

    # Fold the attention scale (model uses embed_dim ** 0.5, not head_dim) into
    # the query projection once, at parameter-preparation time.
    inv_scale = 1.0 / (float(EMBED_DIM) ** 0.5)
    wq = wq * inv_scale
    bq = bq * inv_scale

    g1 = jnp.ones((1, EMBED_DIM), jnp.float32)
    beta1 = jnp.zeros((1, EMBED_DIM), jnp.float32)
    g2 = jnp.ones((1, EMBED_DIM), jnp.float32)
    beta2 = jnp.zeros((1, EMBED_DIM), jnp.float32)

    vecs = jnp.concatenate(
        [bo, g1, beta1, g2, beta2, b2, jnp.zeros((2, EMBED_DIM), jnp.float32)],
        axis=0)                                               # (8, D)

    return dict(
        w_qkv=jnp.concatenate([wq, wk, wv], axis=1).astype(jnp.bfloat16),  # (D, 3D)
        b_qkv=jnp.concatenate([bq, bk, bv], axis=1),                       # (1, 3D)
        wo=wo.astype(jnp.bfloat16),
        w1=w1.astype(jnp.bfloat16), b1=b1,
        w2=w2.astype(jnp.bfloat16),
        vecs=vecs,
    )


if __name__ == "__main__":
    key = jax.random.PRNGKey(0)
    pkey, skey = jax.random.split(key)
    params = init_params(pkey)

    B, S = 2, 8
    src = jax.random.normal(skey, (B, S, EMBED_DIM), jnp.float32)
    # mask: 1 = attend, 0 = masked (broadcast over query positions and heads)
    mask = jnp.ones((B, 1, S), jnp.float32)
    mask = mask.at[1, 0, 6:].set(0.0)   # mask out last two keys of batch element 1

    out = encoder_layer(src, mask, params)
    jax.block_until_ready(out)

    assert out.shape == (B, S, EMBED_DIM), out.shape
    assert bool(jnp.all(jnp.isfinite(out)))
    ref = reference_forward(src, mask, params)
    err = float(jnp.max(jnp.abs(out - ref)))
    assert err < 1e-1, f"max abs error {err}"
    print("KERNEL_OK")
</pallas_src>

<mosaic_0001>
module attributes {stable_mosaic.version = 11 : i64} {
  func.func @_encoder_layer_kernel(%arg0: i32, %arg1: memref<2x8x32xf32, #tpu.memory_space<vmem>>, %arg2: memref<2x1x8xf32, #tpu.memory_space<vmem>>, %arg3: memref<32x96xbf16, #tpu.memory_space<vmem>>, %arg4: memref<1x96xf32, #tpu.memory_space<vmem>>, %arg5: memref<32x32xbf16, #tpu.memory_space<vmem>>, %arg6: memref<32x64xbf16, #tpu.memory_space<vmem>>, %arg7: memref<1x64xf32, #tpu.memory_space<vmem>>, %arg8: memref<64x32xbf16, #tpu.memory_space<vmem>>, %arg9: memref<8x32xf32, #tpu.memory_space<vmem>>, %arg10: memref<2x8x32xf32, #tpu.memory_space<vmem>>) attributes {dimension_semantics = [#tpu.dimension_semantics<parallel>], iteration_bounds = array<i64: 1>, scalar_prefetch = 0 : i64, scratch_operands = 0 : i64, tpu.core_type = #tpu.core_type<tc>, window_params = [{transform_indices = @transform_0, window_bounds = array<i64: 2, 8, 32>}, {transform_indices = @transform_1, window_bounds = array<i64: 2, 1, 8>}, {pipeline_mode = #tpu.pipeline_mode<synchronous>, transform_indices = @transform_2, window_bounds = array<i64: 32, 96>}, {pipeline_mode = #tpu.pipeline_mode<synchronous>, transform_indices = @transform_3, window_bounds = array<i64: 1, 96>}, {pipeline_mode = #tpu.pipeline_mode<synchronous>, transform_indices = @transform_4, window_bounds = array<i64: 32, 32>}, {pipeline_mode = #tpu.pipeline_mode<synchronous>, transform_indices = @transform_5, window_bounds = array<i64: 32, 64>}, {pipeline_mode = #tpu.pipeline_mode<synchronous>, transform_indices = @transform_6, window_bounds = array<i64: 1, 64>}, {pipeline_mode = #tpu.pipeline_mode<synchronous>, transform_indices = @transform_7, window_bounds = array<i64: 64, 32>}, {pipeline_mode = #tpu.pipeline_mode<synchronous>, transform_indices = @transform_8, window_bounds = array<i64: 8, 32>}, {transform_indices = @transform_9, window_bounds = array<i64: 2, 8, 32>}]} {
    %c0 = arith.constant 0 : index
    %c0_0 = arith.constant 0 : index
    %0 = vector.load %arg9[%c0, %c0_0] : memref<8x32xf32, #tpu.memory_space<vmem>>, vector<1x32xf32>
    %c1 = arith.constant 1 : index
    %c0_1 = arith.constant 0 : index
    %1 = vector.load %arg9[%c1, %c0_1] : memref<8x32xf32, #tpu.memory_space<vmem>>, vector<1x32xf32>
    %c2 = arith.constant 2 : index
    %c0_2 = arith.constant 0 : index
    %2 = vector.load %arg9[%c2, %c0_2] : memref<8x32xf32, #tpu.memory_space<vmem>>, vector<1x32xf32>
    %c3 = arith.constant 3 : index
    %c0_3 = arith.constant 0 : index
    %3 = vector.load %arg9[%c3, %c0_3] : memref<8x32xf32, #tpu.memory_space<vmem>>, vector<1x32xf32>
    %c4 = arith.constant 4 : index
    %c0_4 = arith.constant 0 : index
    %4 = vector.load %arg9[%c4, %c0_4] : memref<8x32xf32, #tpu.memory_space<vmem>>, vector<1x32xf32>
    %c5 = arith.constant 5 : index
    %c0_5 = arith.constant 0 : index
    %5 = vector.load %arg9[%c5, %c0_5] : memref<8x32xf32, #tpu.memory_space<vmem>>, vector<1x32xf32>
    %c0_6 = arith.constant 0 : index
    %c0_7 = arith.constant 0 : index
    %c0_8 = arith.constant 0 : index
    %6 = vector.load %arg1[%c0_6, %c0_7, %c0_8] : memref<2x8x32xf32, #tpu.memory_space<vmem>>, vector<2x8x32xf32>
    %7 = vector.shape_cast %6 : vector<2x8x32xf32> to vector<16x32xf32>
    %c0_9 = arith.constant 0 : index
    %c0_10 = arith.constant 0 : index
    %c0_11 = arith.constant 0 : index
    %8 = vector.load %arg2[%c0_9, %c0_10, %c0_11] : memref<2x1x8xf32, #tpu.memory_space<vmem>>, vector<2x1x8xf32>
    %9 = arith.truncf %7 : vector<16x32xf32> to vector<16x32xbf16>
    %c0_12 = arith.constant 0 : index
    %c0_13 = arith.constant 0 : index
    %10 = vector.load %arg3[%c0_12, %c0_13] : memref<32x96xbf16, #tpu.memory_space<vmem>>, vector<32x96xbf16>
    %cst = arith.constant dense<0.000000e+00> : vector<16x96xf32>
    %11 = tpu.matmul %9, %10, %cst {dimension_numbers = #tpu.dot_dimension_numbers<[1], [0], [0], [1], [0, 0, 1, 1], [], []>} : vector<16x32xbf16>, vector<32x96xbf16>, vector<16x96xf32> -> vector<16x96xf32>
    %c0_14 = arith.constant 0 : index
    %c0_15 = arith.constant 0 : index
    %12 = vector.load %arg4[%c0_14, %c0_15] : memref<1x96xf32, #tpu.memory_space<vmem>>, vector<1x96xf32>
    %13 = vector.broadcast %12 : vector<1x96xf32> to vector<16x96xf32>
    %14 = arith.addf %11, %13 : vector<16x96xf32>
    %15 = arith.truncf %14 : vector<16x96xf32> to vector<16x96xbf16>
    %16 = vector.extract_strided_slice %8 {offsets = [0, 0, 0], sizes = [1, 1, 8], strides = [1, 1, 1]} : vector<2x1x8xf32> to vector<1x1x8xf32>
    %17 = vector.shape_cast %16 : vector<1x1x8xf32> to vector<1x8xf32>
    %cst_16 = arith.constant 0.000000e+00 : f32
    %18 = vector.broadcast %cst_16 : f32 to vector<1x8xf32>
    %19 = arith.cmpf oeq, %17, %18 : vector<1x8xf32>
    %cst_17 = arith.constant -1.000000e+20 : f32
    %cst_18 = arith.constant 0.000000e+00 : f32
    %20 = vector.broadcast %cst_17 : f32 to vector<1x8xf32>
    %21 = vector.broadcast %cst_18 : f32 to vector<1x8xf32>
    %22 = arith.select %19, %20, %21 : vector<1x8xi1>, vector<1x8xf32>
    %23 = vector.shape_cast %22 : vector<1x8xf32> to vector<1x8xf32>
    %24 = vector.broadcast %23 : vector<1x8xf32> to vector<8x8xf32>
    %25 = vector.extract_strided_slice %15 {offsets = [0, 0], sizes = [8, 96], strides = [1, 1]} : vector<16x96xbf16> to vector<8x96xbf16>
    %26 = vector.extract_strided_slice %25 {offsets = [0, 0], sizes = [8, 32], strides = [1, 1]} : vector<8x96xbf16> to vector<8x32xbf16>
    %27 = vector.extract_strided_slice %25 {offsets = [0, 32], sizes = [8, 32], strides = [1, 1]} : vector<8x96xbf16> to vector<8x32xbf16>
    %28 = vector.extract_strided_slice %25 {offsets = [0, 64], sizes = [8, 32], strides = [1, 1]} : vector<8x96xbf16> to vector<8x32xbf16>
    %29 = vector.extract_strided_slice %26 {offsets = [0, 0], sizes = [8, 8], strides = [1, 1]} : vector<8x32xbf16> to vector<8x8xbf16>
    %30 = vector.extract_strided_slice %27 {offsets = [0, 0], sizes = [8, 8], strides = [1, 1]} : vector<8x32xbf16> to vector<8x8xbf16>
    %31 = vector.extract_strided_slice %28 {offsets = [0, 0], sizes = [8, 8], strides = [1, 1]} : vector<8x32xbf16> to vector<8x8xbf16>
    %32 = tpu.transpose %30, [1, 0] : vector<8x8xbf16> -> vector<8x8xbf16>
    %cst_19 = arith.constant dense<0.000000e+00> : vector<8x8xf32>
    %33 = tpu.matmul %29, %32, %cst_19 {dimension_numbers = #tpu.dot_dimension_numbers<[1], [0], [0], [1], [0, 0, 1, 1], [], []>} : vector<8x8xbf16>, vector<8x8xbf16>, vector<8x8xf32> -> vector<8x8xf32>
    %34 = arith.addf %33, %24 : vector<8x8xf32>
    %cst_20 = arith.constant dense<0xFF800000> : vector<8xf32>
    %35 = vector.multi_reduction <maximumf>, %34, %cst_20 [1] : vector<8x8xf32> to vector<8xf32>
    %36 = vector.shape_cast %35 : vector<8xf32> to vector<8x1xf32>
    %37 = vector.broadcast %36 : vector<8x1xf32> to vector<8x8xf32>
    %38 = arith.subf %34, %37 : vector<8x8xf32>
    %39 = math.exp %38 : vector<8x8xf32>
    %cst_21 = arith.constant dense<0.000000e+00> : vector<8xf32>
    %40 = vector.multi_reduction <add>, %39, %cst_21 [1] : vector<8x8xf32> to vector<8xf32>
    %41 = vector.shape_cast %40 : vector<8xf32> to vector<8x1xf32>
    %42 = tpu.reciprocal %41 {approx = true} : vector<8x1xf32> -> vector<8x1xf32>
    %43 = vector.broadcast %42 : vector<8x1xf32> to vector<8x8xf32>
    %44 = arith.mulf %39, %43 : vector<8x8xf32>
    %45 = arith.truncf %44 : vector<8x8xf32> to vector<8x8xbf16>
    %cst_22 = arith.constant dense<0.000000e+00> : vector<8x8xf32>
    %46 = tpu.matmul %45, %31, %cst_22 {dimension_numbers = #tpu.dot_dimension_numbers<[1], [0], [0], [1], [0, 0, 1, 1], [], []>} : vector<8x8xbf16>, vector<8x8xbf16>, vector<8x8xf32> -> vector<8x8xf32>
    %47 = vector.extract_strided_slice %26 {offsets = [0, 8], sizes = [8, 8], strides = [1, 1]} : vector<8x32xbf16> to vector<8x8xbf16>
    %48 = vector.extract_strided_slice %27 {offsets = [0, 8], sizes = [8, 8], strides = [1, 1]} : vector<8x32xbf16> to vector<8x8xbf16>
    %49 = vector.extract_strided_slice %28 {offsets = [0, 8], sizes = [8, 8], strides = [1, 1]} : vector<8x32xbf16> to vector<8x8xbf16>
    %50 = tpu.transpose %48, [1, 0] : vector<8x8xbf16> -> vector<8x8xbf16>
    %cst_23 = arith.constant dense<0.000000e+00> : vector<8x8xf32>
    %51 = tpu.matmul %47, %50, %cst_23 {dimension_numbers = #tpu.dot_dimension_numbers<[1], [0], [0], [1], [0, 0, 1, 1], [], []>} : vector<8x8xbf16>, vector<8x8xbf16>, vector<8x8xf32> -> vector<8x8xf32>
    %52 = arith.addf %51, %24 : vector<8x8xf32>
    %cst_24 = arith.constant dense<0xFF800000> : vector<8xf32>
    %53 = vector.multi_reduction <maximumf>, %52, %cst_24 [1] : vector<8x8xf32> to vector<8xf32>
    %54 = vector.shape_cast %53 : vector<8xf32> to vector<8x1xf32>
    %55 = vector.broadcast %54 : vector<8x1xf32> to vector<8x8xf32>
    %56 = arith.subf %52, %55 : vector<8x8xf32>
    %57 = math.exp %56 : vector<8x8xf32>
    %cst_25 = arith.constant dense<0.000000e+00> : vector<8xf32>
    %58 = vector.multi_reduction <add>, %57, %cst_25 [1] : vector<8x8xf32> to vector<8xf32>
    %59 = vector.shape_cast %58 : vector<8xf32> to vector<8x1xf32>
    %60 = tpu.reciprocal %59 {approx = true} : vector<8x1xf32> -> vector<8x1xf32>
    %61 = vector.broadcast %60 : vector<8x1xf32> to vector<8x8xf32>
    %62 = arith.mulf %57, %61 : vector<8x8xf32>
    %63 = arith.truncf %62 : vector<8x8xf32> to vector<8x8xbf16>
    %cst_26 = arith.constant dense<0.000000e+00> : vector<8x8xf32>
    %64 = tpu.matmul %63, %49, %cst_26 {dimension_numbers = #tpu.dot_dimension_numbers<[1], [0], [0], [1], [0, 0, 1, 1], [], []>} : vector<8x8xbf16>, vector<8x8xbf16>, vector<8x8xf32> -> vector<8x8xf32>
    %65 = vector.extract_strided_slice %26 {offsets = [0, 16], sizes = [8, 8], strides = [1, 1]} : vector<8x32xbf16> to vector<8x8xbf16>
    %66 = vector.extract_strided_slice %27 {offsets = [0, 16], sizes = [8, 8], strides = [1, 1]} : vector<8x32xbf16> to vector<8x8xbf16>
    %67 = vector.extract_strided_slice %28 {offsets = [0, 16], sizes = [8, 8], strides = [1, 1]} : vector<8x32xbf16> to vector<8x8xbf16>
    %68 = tpu.transpose %66, [1, 0] : vector<8x8xbf16> -> vector<8x8xbf16>
    %cst_27 = arith.constant dense<0.000000e+00> : vector<8x8xf32>
    %69 = tpu.matmul %65, %68, %cst_27 {dimension_numbers = #tpu.dot_dimension_numbers<[1], [0], [0], [1], [0, 0, 1, 1], [], []>} : vector<8x8xbf16>, vector<8x8xbf16>, vector<8x8xf32> -> vector<8x8xf32>
    %70 = arith.addf %69, %24 : vector<8x8xf32>
    %cst_28 = arith.constant dense<0xFF800000> : vector<8xf32>
    %71 = vector.multi_reduction <maximumf>, %70, %cst_28 [1] : vector<8x8xf32> to vector<8xf32>
    %72 = vector.shape_cast %71 : vector<8xf32> to vector<8x1xf32>
    %73 = vector.broadcast %72 : vector<8x1xf32> to vector<8x8xf32>
    %74 = arith.subf %70, %73 : vector<8x8xf32>
    %75 = math.exp %74 : vector<8x8xf32>
    %cst_29 = arith.constant dense<0.000000e+00> : vector<8xf32>
    %76 = vector.multi_reduction <add>, %75, %cst_29 [1] : vector<8x8xf32> to vector<8xf32>
    %77 = vector.shape_cast %76 : vector<8xf32> to vector<8x1xf32>
    %78 = tpu.reciprocal %77 {approx = true} : vector<8x1xf32> -> vector<8x1xf32>
    %79 = vector.broadcast %78 : vector<8x1xf32> to vector<8x8xf32>
    %80 = arith.mulf %75, %79 : vector<8x8xf32>
    %81 = arith.truncf %80 : vector<8x8xf32> to vector<8x8xbf16>
    %cst_30 = arith.constant dense<0.000000e+00> : vector<8x8xf32>
    %82 = tpu.matmul %81, %67, %cst_30 {dimension_numbers = #tpu.dot_dimension_numbers<[1], [0], [0], [1], [0, 0, 1, 1], [], []>} : vector<8x8xbf16>, vector<8x8xbf16>, vector<8x8xf32> -> vector<8x8xf32>
    %83 = vector.extract_strided_slice %26 {offsets = [0, 24], sizes = [8, 8], strides = [1, 1]} : vector<8x32xbf16> to vector<8x8xbf16>
    %84 = vector.extract_strided_slice %27 {offsets = [0, 24], sizes = [8, 8], strides = [1, 1]} : vector<8x32xbf16> to vector<8x8xbf16>
    %85 = vector.extract_strided_slice %28 {offsets = [0, 24], sizes = [8, 8], strides = [1, 1]} : vector<8x32xbf16> to vector<8x8xbf16>
    %86 = tpu.transpose %84, [1, 0] : vector<8x8xbf16> -> vector<8x8xbf16>
    %cst_31 = arith.constant dense<0.000000e+00> : vector<8x8xf32>
    %87 = tpu.matmul %83, %86, %cst_31 {dimension_numbers = #tpu.dot_dimension_numbers<[1], [0], [0], [1], [0, 0, 1, 1], [], []>} : vector<8x8xbf16>, vector<8x8xbf16>, vector<8x8xf32> -> vector<8x8xf32>
    %88 = arith.addf %87, %24 : vector<8x8xf32>
    %cst_32 = arith.constant dense<0xFF800000> : vector<8xf32>
    %89 = vector.multi_reduction <maximumf>, %88, %cst_32 [1] : vector<8x8xf32> to vector<8xf32>
    %90 = vector.shape_cast %89 : vector<8xf32> to vector<8x1xf32>
    %91 = vector.broadcast %90 : vector<8x1xf32> to vector<8x8xf32>
    %92 = arith.subf %88, %91 : vector<8x8xf32>
    %93 = math.exp %92 : vector<8x8xf32>
    %cst_33 = arith.constant dense<0.000000e+00> : vector<8xf32>
    %94 = vector.multi_reduction <add>, %93, %cst_33 [1] : vector<8x8xf32> to vector<8xf32>
    %95 = vector.shape_cast %94 : vector<8xf32> to vector<8x1xf32>
    %96 = tpu.reciprocal %95 {approx = true} : vector<8x1xf32> -> vector<8x1xf32>
    %97 = vector.broadcast %96 : vector<8x1xf32> to vector<8x8xf32>
    %98 = arith.mulf %93, %97 : vector<8x8xf32>
    %99 = arith.truncf %98 : vector<8x8xf32> to vector<8x8xbf16>
    %cst_34 = arith.constant dense<0.000000e+00> : vector<8x8xf32>
    %100 = tpu.matmul %99, %85, %cst_34 {dimension_numbers = #tpu.dot_dimension_numbers<[1], [0], [0], [1], [0, 0, 1, 1], [], []>} : vector<8x8xbf16>, vector<8x8xbf16>, vector<8x8xf32> -> vector<8x8xf32>
    %101 = tpu.concatenate %46, %64, %82, %100 in 1 : vector<8x8xf32>, vector<8x8xf32>, vector<8x8xf32>, vector<8x8xf32> -> vector<8x32xf32>
    %102 = vector.extract_strided_slice %8 {offsets = [1, 0, 0], sizes = [1, 1, 8], strides = [1, 1, 1]} : vector<2x1x8xf32> to vector<1x1x8xf32>
    %103 = vector.shape_cast %102 : vector<1x1x8xf32> to vector<1x8xf32>
    %cst_35 = arith.constant 0.000000e+00 : f32
    %104 = vector.broadcast %cst_35 : f32 to vector<1x8xf32>
    %105 = arith.cmpf oeq, %103, %104 : vector<1x8xf32>
    %cst_36 = arith.constant -1.000000e+20 : f32
    %cst_37 = arith.constant 0.000000e+00 : f32
    %106 = vector.broadcast %cst_36 : f32 to vector<1x8xf32>
    %107 = vector.broadcast %cst_37 : f32 to vector<1x8xf32>
    %108 = arith.select %105, %106, %107 : vector<1x8xi1>, vector<1x8xf32>
    %109 = vector.shape_cast %108 : vector<1x8xf32> to vector<1x8xf32>
    %110 = vector.broadcast %109 : vector<1x8xf32> to vector<8x8xf32>
    %111 = vector.extract_strided_slice %15 {offsets = [8, 0], sizes = [8, 96], strides = [1, 1]} : vector<16x96xbf16> to vector<8x96xbf16>
    %112 = vector.extract_strided_slice %111 {offsets = [0, 0], sizes = [8, 32], strides = [1, 1]} : vector<8x96xbf16> to vector<8x32xbf16>
    %113 = vector.extract_strided_slice %111 {offsets = [0, 32], sizes = [8, 32], strides = [1, 1]} : vector<8x96xbf16> to vector<8x32xbf16>
    %114 = vector.extract_strided_slice %111 {offsets = [0, 64], sizes = [8, 32], strides = [1, 1]} : vector<8x96xbf16> to vector<8x32xbf16>
    %115 = vector.extract_strided_slice %112 {offsets = [0, 0], sizes = [8, 8], strides = [1, 1]} : vector<8x32xbf16> to vector<8x8xbf16>
    %116 = vector.extract_strided_slice %113 {offsets = [0, 0], sizes = [8, 8], strides = [1, 1]} : vector<8x32xbf16> to vector<8x8xbf16>
    %117 = vector.extract_strided_slice %114 {offsets = [0, 0], sizes = [8, 8], strides = [1, 1]} : vector<8x32xbf16> to vector<8x8xbf16>
    %118 = tpu.transpose %116, [1, 0] : vector<8x8xbf16> -> vector<8x8xbf16>
    %cst_38 = arith.constant dense<0.000000e+00> : vector<8x8xf32>
    %119 = tpu.matmul %115, %118, %cst_38 {dimension_numbers = #tpu.dot_dimension_numbers<[1], [0], [0], [1], [0, 0, 1, 1], [], []>} : vector<8x8xbf16>, vector<8x8xbf16>, vector<8x8xf32> -> vector<8x8xf32>
    %120 = arith.addf %119, %110 : vector<8x8xf32>
    %cst_39 = arith.constant dense<0xFF800000> : vector<8xf32>
    %121 = vector.multi_reduction <maximumf>, %120, %cst_39 [1] : vector<8x8xf32> to vector<8xf32>
    %122 = vector.shape_cast %121 : vector<8xf32> to vector<8x1xf32>
    %123 = vector.broadcast %122 : vector<8x1xf32> to vector<8x8xf32>
    %124 = arith.subf %120, %123 : vector<8x8xf32>
    %125 = math.exp %124 : vector<8x8xf32>
    %cst_40 = arith.constant dense<0.000000e+00> : vector<8xf32>
    %126 = vector.multi_reduction <add>, %125, %cst_40 [1] : vector<8x8xf32> to vector<8xf32>
    %127 = vector.shape_cast %126 : vector<8xf32> to vector<8x1xf32>
    %128 = tpu.reciprocal %127 {approx = true} : vector<8x1xf32> -> vector<8x1xf32>
    %129 = vector.broadcast %128 : vector<8x1xf32> to vector<8x8xf32>
    %130 = arith.mulf %125, %129 : vector<8x8xf32>
    %131 = arith.truncf %130 : vector<8x8xf32> to vector<8x8xbf16>
    %cst_41 = arith.constant dense<0.000000e+00> : vector<8x8xf32>
    %132 = tpu.matmul %131, %117, %cst_41 {dimension_numbers = #tpu.dot_dimension_numbers<[1], [0], [0], [1], [0, 0, 1, 1], [], []>} : vector<8x8xbf16>, vector<8x8xbf16>, vector<8x8xf32> -> vector<8x8xf32>
    %133 = vector.extract_strided_slice %112 {offsets = [0, 8], sizes = [8, 8], strides = [1, 1]} : vector<8x32xbf16> to vector<8x8xbf16>
    %134 = vector.extract_strided_slice %113 {offsets = [0, 8], sizes = [8, 8], strides = [1, 1]} : vector<8x32xbf16> to vector<8x8xbf16>
    %135 = vector.extract_strided_slice %114 {offsets = [0, 8], sizes = [8, 8], strides = [1, 1]} : vector<8x32xbf16> to vector<8x8xbf16>
    %136 = tpu.transpose %134, [1, 0] : vector<8x8xbf16> -> vector<8x8xbf16>
    %cst_42 = arith.constant dense<0.000000e+00> : vector<8x8xf32>
    %137 = tpu.matmul %133, %136, %cst_42 {dimension_numbers = #tpu.dot_dimension_numbers<[1], [0], [0], [1], [0, 0, 1, 1], [], []>} : vector<8x8xbf16>, vector<8x8xbf16>, vector<8x8xf32> -> vector<8x8xf32>
    %138 = arith.addf %137, %110 : vector<8x8xf32>
    %cst_43 = arith.constant dense<0xFF800000> : vector<8xf32>
    %139 = vector.multi_reduction <maximumf>, %138, %cst_43 [1] : vector<8x8xf32> to vector<8xf32>
    %140 = vector.shape_cast %139 : vector<8xf32> to vector<8x1xf32>
    %141 = vector.broadcast %140 : vector<8x1xf32> to vector<8x8xf32>
    %142 = arith.subf %138, %141 : vector<8x8xf32>
    %143 = math.exp %142 : vector<8x8xf32>
    %cst_44 = arith.constant dense<0.000000e+00> : vector<8xf32>
    %144 = vector.multi_reduction <add>, %143, %cst_44 [1] : vector<8x8xf32> to vector<8xf32>
    %145 = vector.shape_cast %144 : vector<8xf32> to vector<8x1xf32>
    %146 = tpu.reciprocal %145 {approx = true} : vector<8x1xf32> -> vector<8x1xf32>
    %147 = vector.broadcast %146 : vector<8x1xf32> to vector<8x8xf32>
    %148 = arith.mulf %143, %147 : vector<8x8xf32>
    %149 = arith.truncf %148 : vector<8x8xf32> to vector<8x8xbf16>
    %cst_45 = arith.constant dense<0.000000e+00> : vector<8x8xf32>
    %150 = tpu.matmul %149, %135, %cst_45 {dimension_numbers = #tpu.dot_dimension_numbers<[1], [0], [0], [1], [0, 0, 1, 1], [], []>} : vector<8x8xbf16>, vector<8x8xbf16>, vector<8x8xf32> -> vector<8x8xf32>
    %151 = vector.extract_strided_slice %112 {offsets = [0, 16], sizes = [8, 8], strides = [1, 1]} : vector<8x32xbf16> to vector<8x8xbf16>
    %152 = vector.extract_strided_slice %113 {offsets = [0, 16], sizes = [8, 8], strides = [1, 1]} : vector<8x32xbf16> to vector<8x8xbf16>
    %153 = vector.extract_strided_slice %114 {offsets = [0, 16], sizes = [8, 8], strides = [1, 1]} : vector<8x32xbf16> to vector<8x8xbf16>
    %154 = tpu.transpose %152, [1, 0] : vector<8x8xbf16> -> vector<8x8xbf16>
    %cst_46 = arith.constant dense<0.000000e+00> : vector<8x8xf32>
    %155 = tpu.matmul %151, %154, %cst_46 {dimension_numbers = #tpu.dot_dimension_numbers<[1], [0], [0], [1], [0, 0, 1, 1], [], []>} : vector<8x8xbf16>, vector<8x8xbf16>, vector<8x8xf32> -> vector<8x8xf32>
    %156 = arith.addf %155, %110 : vector<8x8xf32>
    %cst_47 = arith.constant dense<0xFF800000> : vector<8xf32>
    %157 = vector.multi_reduction <maximumf>, %156, %cst_47 [1] : vector<8x8xf32> to vector<8xf32>
    %158 = vector.shape_cast %157 : vector<8xf32> to vector<8x1xf32>
    %159 = vector.broadcast %158 : vector<8x1xf32> to vector<8x8xf32>
    %160 = arith.subf %156, %159 : vector<8x8xf32>
    %161 = math.exp %160 : vector<8x8xf32>
    %cst_48 = arith.constant dense<0.000000e+00> : vector<8xf32>
    %162 = vector.multi_reduction <add>, %161, %cst_48 [1] : vector<8x8xf32> to vector<8xf32>
    %163 = vector.shape_cast %162 : vector<8xf32> to vector<8x1xf32>
    %164 = tpu.reciprocal %163 {approx = true} : vector<8x1xf32> -> vector<8x1xf32>
    %165 = vector.broadcast %164 : vector<8x1xf32> to vector<8x8xf32>
    %166 = arith.mulf %161, %165 : vector<8x8xf32>
    %167 = arith.truncf %166 : vector<8x8xf32> to vector<8x8xbf16>
    %cst_49 = arith.constant dense<0.000000e+00> : vector<8x8xf32>
    %168 = tpu.matmul %167, %153, %cst_49 {dimension_numbers = #tpu.dot_dimension_numbers<[1], [0], [0], [1], [0, 0, 1, 1], [], []>} : vector<8x8xbf16>, vector<8x8xbf16>, vector<8x8xf32> -> vector<8x8xf32>
    %169 = vector.extract_strided_slice %112 {offsets = [0, 24], sizes = [8, 8], strides = [1, 1]} : vector<8x32xbf16> to vector<8x8xbf16>
    %170 = vector.extract_strided_slice %113 {offsets = [0, 24], sizes = [8, 8], strides = [1, 1]} : vector<8x32xbf16> to vector<8x8xbf16>
    %171 = vector.extract_strided_slice %114 {offsets = [0, 24], sizes = [8, 8], strides = [1, 1]} : vector<8x32xbf16> to vector<8x8xbf16>
    %172 = tpu.transpose %170, [1, 0] : vector<8x8xbf16> -> vector<8x8xbf16>
    %cst_50 = arith.constant dense<0.000000e+00> : vector<8x8xf32>
    %173 = tpu.matmul %169, %172, %cst_50 {dimension_numbers = #tpu.dot_dimension_numbers<[1], [0], [0], [1], [0, 0, 1, 1], [], []>} : vector<8x8xbf16>, vector<8x8xbf16>, vector<8x8xf32> -> vector<8x8xf32>
    %174 = arith.addf %173, %110 : vector<8x8xf32>
    %cst_51 = arith.constant dense<0xFF800000> : vector<8xf32>
    %175 = vector.multi_reduction <maximumf>, %174, %cst_51 [1] : vector<8x8xf32> to vector<8xf32>
    %176 = vector.shape_cast %175 : vector<8xf32> to vector<8x1xf32>
    %177 = vector.broadcast %176 : vector<8x1xf32> to vector<8x8xf32>
    %178 = arith.subf %174, %177 : vector<8x8xf32>
    %179 = math.exp %178 : vector<8x8xf32>
    %cst_52 = arith.constant dense<0.000000e+00> : vector<8xf32>
    %180 = vector.multi_reduction <add>, %179, %cst_52 [1] : vector<8x8xf32> to vector<8xf32>
    %181 = vector.shape_cast %180 : vector<8xf32> to vector<8x1xf32>
    %182 = tpu.reciprocal %181 {approx = true} : vector<8x1xf32> -> vector<8x1xf32>
    %183 = vector.broadcast %182 : vector<8x1xf32> to vector<8x8xf32>
    %184 = arith.mulf %179, %183 : vector<8x8xf32>
    %185 = arith.truncf %184 : vector<8x8xf32> to vector<8x8xbf16>
    %cst_53 = arith.constant dense<0.000000e+00> : vector<8x8xf32>
    %186 = tpu.matmul %185, %171, %cst_53 {dimension_numbers = #tpu.dot_dimension_numbers<[1], [0], [0], [1], [0, 0, 1, 1], [], []>} : vector<8x8xbf16>, vector<8x8xbf16>, vector<8x8xf32> -> vector<8x8xf32>
    %187 = tpu.concatenate %132, %150, %168, %186 in 1 : vector<8x8xf32>, vector<8x8xf32>, vector<8x8xf32>, vector<8x8xf32> -> vector<8x32xf32>
    %188 = tpu.concatenate %101, %187 in 0 : vector<8x32xf32>, vector<8x32xf32> -> vector<16x32xf32>
    %189 = arith.truncf %188 : vector<16x32xf32> to vector<16x32xbf16>
    %c0_54 = arith.constant 0 : index
    %c0_55 = arith.constant 0 : index
    %190 = vector.load %arg5[%c0_54, %c0_55] : memref<32x32xbf16, #tpu.memory_space<vmem>>, vector<32x32xbf16>
    %cst_56 = arith.constant dense<0.000000e+00> : vector<16x32xf32>
    %191 = tpu.matmul %189, %190, %cst_56 {dimension_numbers = #tpu.dot_dimension_numbers<[1], [0], [0], [1], [0, 0, 1, 1], [], []>} : vector<16x32xbf16>, vector<32x32xbf16>, vector<16x32xf32> -> vector<16x32xf32>
    %192 = vector.broadcast %0 : vector<1x32xf32> to vector<16x32xf32>
    %193 = arith.addf %191, %192 : vector<16x32xf32>
    %194 = arith.addf %193, %7 : vector<16x32xf32>
    %cst_57 = arith.constant dense<0.000000e+00> : vector<16xf32>
    %195 = vector.multi_reduction <add>, %194, %cst_57 [1] : vector<16x32xf32> to vector<16xf32>
    %196 = vector.shape_cast %195 : vector<16xf32> to vector<16x1xf32>
    %cst_58 = arith.constant 3.200000e+01 : f32
    %197 = vector.broadcast %cst_58 : f32 to vector<16x1xf32>
    %198 = arith.divf %196, %197 : vector<16x1xf32>
    %199 = vector.broadcast %198 : vector<16x1xf32> to vector<16x32xf32>
    %200 = arith.subf %194, %199 : vector<16x32xf32>
    %201 = arith.mulf %200, %200 : vector<16x32xf32>
    %cst_59 = arith.constant dense<0.000000e+00> : vector<16xf32>
    %202 = vector.multi_reduction <add>, %201, %cst_59 [1] : vector<16x32xf32> to vector<16xf32>
    %203 = vector.shape_cast %202 : vector<16xf32> to vector<16x1xf32>
    %cst_60 = arith.constant 3.200000e+01 : f32
    %204 = vector.broadcast %cst_60 : f32 to vector<16x1xf32>
    %205 = arith.divf %203, %204 : vector<16x1xf32>
    %206 = vector.broadcast %198 : vector<16x1xf32> to vector<16x32xf32>
    %207 = arith.subf %194, %206 : vector<16x32xf32>
    %cst_61 = arith.constant 9.99999974E-6 : f32
    %208 = vector.broadcast %cst_61 : f32 to vector<16x1xf32>
    %209 = arith.addf %205, %208 : vector<16x1xf32>
    %210 = math.rsqrt %209 : vector<16x1xf32>
    %211 = vector.broadcast %210 : vector<16x1xf32> to vector<16x32xf32>
    %212 = arith.mulf %207, %211 : vector<16x32xf32>
    %213 = vector.broadcast %1 : vector<1x32xf32> to vector<16x32xf32>
    %214 = arith.mulf %212, %213 : vector<16x32xf32>
    %215 = vector.broadcast %2 : vector<1x32xf32> to vector<16x32xf32>
    %216 = arith.addf %214, %215 : vector<16x32xf32>
    %217 = arith.truncf %216 : vector<16x32xf32> to vector<16x32xbf16>
    %c0_62 = arith.constant 0 : index
    %c0_63 = arith.constant 0 : index
    %218 = vector.load %arg6[%c0_62, %c0_63] : memref<32x64xbf16, #tpu.memory_space<vmem>>, vector<32x64xbf16>
    %cst_64 = arith.constant dense<0.000000e+00> : vector<16x64xf32>
    %219 = tpu.matmul %217, %218, %cst_64 {dimension_numbers = #tpu.dot_dimension_numbers<[1], [0], [0], [1], [0, 0, 1, 1], [], []>} : vector<16x32xbf16>, vector<32x64xbf16>, vector<16x64xf32> -> vector<16x64xf32>
    %c0_65 = arith.constant 0 : index
    %c0_66 = arith.constant 0 : index
    %220 = vector.load %arg7[%c0_65, %c0_66] : memref<1x64xf32, #tpu.memory_space<vmem>>, vector<1x64xf32>
    %221 = vector.broadcast %220 : vector<1x64xf32> to vector<16x64xf32>
    %222 = arith.addf %219, %221 : vector<16x64xf32>
    %cst_67 = arith.constant 0.000000e+00 : f32
    %223 = vector.broadcast %cst_67 : f32 to vector<16x64xf32>
    %224 = arith.maximumf %222, %223 : vector<16x64xf32>
    %225 = arith.truncf %224 : vector<16x64xf32> to vector<16x64xbf16>
    %c0_68 = arith.constant 0 : index
    %c0_69 = arith.constant 0 : index
    %226 = vector.load %arg8[%c0_68, %c0_69] : memref<64x32xbf16, #tpu.memory_space<vmem>>, vector<64x32xbf16>
    %cst_70 = arith.constant dense<0.000000e+00> : vector<16x32xf32>
    %227 = tpu.matmul %225, %226, %cst_70 {dimension_numbers = #tpu.dot_dimension_numbers<[1], [0], [0], [1], [0, 0, 1, 1], [], []>} : vector<16x64xbf16>, vector<64x32xbf16>, vector<16x32xf32> -> vector<16x32xf32>
    %228 = vector.broadcast %5 : vector<1x32xf32> to vector<16x32xf32>
    %229 = arith.addf %227, %228 : vector<16x32xf32>
    %230 = arith.addf %229, %216 : vector<16x32xf32>
    %cst_71 = arith.constant dense<0.000000e+00> : vector<16xf32>
    %231 = vector.multi_reduction <add>, %230, %cst_71 [1] : vector<16x32xf32> to vector<16xf32>
    %232 = vector.shape_cast %231 : vector<16xf32> to vector<16x1xf32>
    %cst_72 = arith.constant 3.200000e+01 : f32
    %233 = vector.broadcast %cst_72 : f32 to vector<16x1xf32>
    %234 = arith.divf %232, %233 : vector<16x1xf32>
    %235 = vector.broadcast %234 : vector<16x1xf32> to vector<16x32xf32>
    %236 = arith.subf %230, %235 : vector<16x32xf32>
    %237 = arith.mulf %236, %236 : vector<16x32xf32>
    %cst_73 = arith.constant dense<0.000000e+00> : vector<16xf32>
    %238 = vector.multi_reduction <add>, %237, %cst_73 [1] : vector<16x32xf32> to vector<16xf32>
    %239 = vector.shape_cast %238 : vector<16xf32> to vector<16x1xf32>
    %cst_74 = arith.constant 3.200000e+01 : f32
    %240 = vector.broadcast %cst_74 : f32 to vector<16x1xf32>
    %241 = arith.divf %239, %240 : vector<16x1xf32>
    %242 = vector.broadcast %234 : vector<16x1xf32> to vector<16x32xf32>
    %243 = arith.subf %230, %242 : vector<16x32xf32>
    %cst_75 = arith.constant 9.99999974E-6 : f32
    %244 = vector.broadcast %cst_75 : f32 to vector<16x1xf32>
    %245 = arith.addf %241, %244 : vector<16x1xf32>
    %246 = math.rsqrt %245 : vector<16x1xf32>
    %247 = vector.broadcast %246 : vector<16x1xf32> to vector<16x32xf32>
    %248 = arith.mulf %243, %247 : vector<16x32xf32>
    %249 = vector.broadcast %3 : vector<1x32xf32> to vector<16x32xf32>
    %250 = arith.mulf %248, %249 : vector<16x32xf32>
    %251 = vector.broadcast %4 : vector<1x32xf32> to vector<16x32xf32>
    %252 = arith.addf %250, %251 : vector<16x32xf32>
    %253 = vector.shape_cast %252 : vector<16x32xf32> to vector<2x8x32xf32>
    %c0_76 = arith.constant 0 : index
    %c0_77 = arith.constant 0 : index
    %c0_78 = arith.constant 0 : index
    %254 = vector.load %arg10[%c0_76, %c0_77, %c0_78] : memref<2x8x32xf32, #tpu.memory_space<vmem>>, vector<2x8x32xf32>
    tpu.vector_store %arg10[%c0_76, %c0_77, %c0_78], %253 {strides = array<i32>} : memref<2x8x32xf32, #tpu.memory_space<vmem>>, vector<2x8x32xf32>,
    return
  }
  func.func @transform_0(%arg0: i32) -> (i32, i32, i32) {
    %c0_i32 = arith.constant 0 : i32
    %c0_i32_0 = arith.constant 0 : i32
    %c0_i32_1 = arith.constant 0 : i32
    return %arg0, %c0_i32, %c0_i32_0 : i32, i32, i32
  }
  func.func @transform_1(%arg0: i32) -> (i32, i32, i32) {
    %c0_i32 = arith.constant 0 : i32
    %c0_i32_0 = arith.constant 0 : i32
    %c0_i32_1 = arith.constant 0 : i32
    return %arg0, %c0_i32, %c0_i32_0 : i32, i32, i32
  }
  func.func @transform_2(%arg0: i32) -> (i32, i32) {
    %c0_i32 = arith.constant 0 : i32
    %c0_i32_0 = arith.constant 0 : i32
    %c0_i32_1 = arith.constant 0 : i32
    return %c0_i32, %c0_i32_0 : i32, i32
  }
  func.func @transform_3(%arg0: i32) -> (i32, i32) {
    %c0_i32 = arith.constant 0 : i32
    %c0_i32_0 = arith.constant 0 : i32
    %c0_i32_1 = arith.constant 0 : i32
    return %c0_i32, %c0_i32_0 : i32, i32
  }
  func.func @transform_4(%arg0: i32) -> (i32, i32) {
    %c0_i32 = arith.constant 0 : i32
    %c0_i32_0 = arith.constant 0 : i32
    %c0_i32_1 = arith.constant 0 : i32
    return %c0_i32, %c0_i32_0 : i32, i32
  }
  func.func @transform_5(%arg0: i32) -> (i32, i32) {
    %c0_i32 = arith.constant 0 : i32
    %c0_i32_0 = arith.constant 0 : i32
    %c0_i32_1 = arith.constant 0 : i32
    return %c0_i32, %c0_i32_0 : i32, i32
  }
  func.func @transform_6(%arg0: i32) -> (i32, i32) {
    %c0_i32 = arith.constant 0 : i32
    %c0_i32_0 = arith.constant 0 : i32
    %c0_i32_1 = arith.constant 0 : i32
    return %c0_i32, %c0_i32_0 : i32, i32
  }
  func.func @transform_7(%arg0: i32) -> (i32, i32) {
    %c0_i32 = arith.constant 0 : i32
    %c0_i32_0 = arith.constant 0 : i32
    %c0_i32_1 = arith.constant 0 : i32
    return %c0_i32, %c0_i32_0 : i32, i32
  }
  func.func @transform_8(%arg0: i32) -> (i32, i32) {
    %c0_i32 = arith.constant 0 : i32
    %c0_i32_0 = arith.constant 0 : i32
    %c0_i32_1 = arith.constant 0 : i32
    return %c0_i32, %c0_i32_0 : i32, i32
  }
  func.func @transform_9(%arg0: i32) -> (i32, i32, i32) {
    %c0_i32 = arith.constant 0 : i32
    %c0_i32_0 = arith.constant 0 : i32
    %c0_i32_1 = arith.constant 0 : i32
    return %arg0, %c0_i32, %c0_i32_0 : i32, i32, i32
  }
}

</mosaic_0001>

<bundles_post_ra>
// kernel: tpu_custom_call.1
= control target key start
LH: loop header
LB: loop body
LE: loop exit
PB: predicated region body
PF: predicated region fallthrough
CT: control target
= control target key end

     0   :  { %14 = vsyncpa [#allocation3], 0  ;;  %s2123_s0 = inlined_call_operand.vmem [shape: f32[2,8,32], index: 0, kind: input, shape index: {}]   ;;  %s2124_s1 = inlined_call_operand.hbm [shape: f32[2,1,8], index: 1, kind: input, shape index: {}]   ;;  %s2125_s2 = inlined_call_operand.vmem [shape: bf16[32,96], index: 2, kind: input, shape index: {}]   ;;  %s2126_s3 = inlined_call_operand.vmem [shape: f32[1,96], index: 3, kind: input, shape index: {}]   ;;  %s2127_s4 = inlined_call_operand.vmem [shape: bf16[32,32], index: 4, kind: input, shape index: {}]   ;;  %s2128_s5 = inlined_call_operand.hbm [shape: bf16[32,64], index: 5, kind: input, shape index: {}]   ;;  %s2129_s6 = inlined_call_operand.vmem [shape: f32[1,64], index: 6, kind: input, shape index: {}]   ;;  %s2130_s7 = inlined_call_operand.vmem [shape: bf16[64,32], index: 7, kind: input, shape index: {}]   ;;  %s2131_s8 = inlined_call_operand.vmem [shape: f32[8,32], index: 8, kind: input, shape index: {}]   ;;  %s2132_s9 = inlined_call_operand.hbm [shape: f32[2,8,32], index: 9, kind: output, shape index: {}]  }
   0x1   :  { %15 = vsyncpa [#allocation6], 0 }
   0x2   :  { %16 = vsyncpa [#allocation4], 0  ;;  %s1757_s30 = smov [#allocation2]  }
   0x3   :  { %s24_s10 = sshll.u32 %s1757_s30, 4  ;;  %s25_s10 = int_to_ptr.vmem [resolvable:$true] %s24_s10 }
   0x4   :  { %s1699_s11 = scalar_lea.vmem %s25_s10, 32  ;;  %p1704_p1 = scmp.lt.s32.totalorder %s25_s10, %s25_s10 }
   0x5   :  { %p1700_p0 = scmp.ne.s32.totalorder %s25_s10, %s1699_s11  ;;  %p1705_p2 = scmp.lt.s32.totalorder %s1699_s11, %s1699_s11 }
   0x7   :  { %p1706_p3 = por %p1705_p2, %p1704_p1 }
   0x9   :  { %p1707_p4 = pnand %p1706_p3, %p1700_p0 }
   0xb   :  { %1710 = shalt.err (!%p1707_p4)
}
   0xc   :  { %s1758_s12 = smov 16   ;;  %s1759_s13 = smov 1  }
   0xd   :  { %30 = dma.hbm_to_vmem [thread:$0]  %s2124_s1, 32, %s25_s10, [#allocation3], %s1758_s12, %s1758_s12, %s1759_s13  }
   0xe   :  { %s1760_s16 = smov [#allocation5]  }
   0xf   :  { %s42_s17 = sshll.u32 %s1760_s16, 4  ;;  %s43_s17 = int_to_ptr.vmem [resolvable:$true] %s42_s17 }
  0x10   :  { %s1719_s18 = scalar_lea.vmem %s43_s17, 256  ;;  %p1724_p6 = scmp.lt.s32.totalorder %s43_s17, %s43_s17 }
  0x11   :  { %p1720_p5 = scmp.ne.s32.totalorder %s43_s17, %s1719_s18  ;;  %p1725_p7 = scmp.lt.s32.totalorder %s1719_s18, %s1719_s18 }
  0x13   :  { %p1726_p8 = por %p1725_p7, %p1724_p6 }
  0x15   :  { %p1727_p9 = pnand %p1726_p8, %p1720_p5 }
  0x17   :  { %1730 = shalt.err (!%p1727_p9)
}
  0x18   :  { %s1761_s19 = smov 64   ;;  %s1762_s20 = smov 4  }
  0x19   :  { %48 = dma.hbm_to_vmem [thread:$0]  %s2128_s5, 256, %s43_s17, [#allocation6], %s1761_s19, %s1761_s19, %s1762_s20  }
  0x1a   :  { %1751 = dma.done.wait [#allocation3], 32  }
  0x1b   :  { %1752 = vsyncadd [#allocation3], 4294967264 }
  0x1c   :  { %1753 = dma.done.wait [#allocation6], 256  }
  0x1d   :  { %1754 = vsyncadd [#allocation6], 4294967040  ;;  %v1763_v0 = vmov 0.0   ;;  %vm1764_vm0 = vmmov 0   ;;  %v1641_v1 = vld [vmem:[%s2125_s2 + $0x8] sm:$0xff]   ;;  %v1642_v2 = vld [vmem:[%s2125_s2] sm:$0xff]   ;;  %v145_v37 = vlaneseq }
  0x1e   :  { %1472 = vmatprep.subr.bf16.mxu0 %v1763_v0  ;;  %1476 = vmatprep.mubr.msk.bf16.mxu0 %vm1764_vm0, %v1763_v0  ;;  %v1854_v3 = vld [vmem:[%s2123_s0] sm:$0xff]  ;;  %v1859_v4 = vld [vmem:[%s2123_s0 + $0x8] sm:$0xff]  ;;  %vm96_vm1 = vcmask 261120   ;;  %s1765_s0 = smov 120   ;;  %s1766_s30 = smov 96   ;;  %vm153_vm2 = vcmask 64512  }
  0x1f   :  { %1480 = vmatprep.subr.bf16.mxu1 %v1763_v0  ;;  %1482 = vmatprep.mubr.msk.bf16.mxu1 %vm1764_vm0, %v1763_v0  ;;  %v72_v5 = vpack.c.bf16 %v1859_v4, %v1854_v3  ;;  %v1388_v7 = vld [vmem:[%s2126_s3] ss:$0 sm:$0xff]  ;;  %s1767_s10 = smov 80   ;;  %s1768_s11 = smov 88   ;;  %v146_v39 = vshrl.u32 %v145_v37, 7  ;;  %vm217_vm5 = vcmask 1043456  }
  0x20   :  { %1473 = vmatpush3.bf16.msra.mxu0 %v1641_v1  ;;  %s1769_s3 = smov 72   ;;  %s1770_s13 = smov 112   ;;  %v70_v38 = vld [vmem:[#allocation2] sm:$0x1]  ;;  %v71_v60 = vld [vmem:[#allocation2 + $0x1] sm:$0x1] }
  0x21   :  { %1474 = vmatprep.subr.bf16.mxu0 %v1763_v0  ;;  %s1771_s14 = smov 104   ;;  %vm142_vm3 = vcmp.eq.f32.partialorder %v70_v38, 0.0  ;;  %v147_v40 = vsub.s32 0, %v146_v39  ;;  %vm608_vm4 = vcmp.eq.f32.partialorder %v71_v60, 0.0  ;;  %s1772_s15 = smov 56   ;;  %vm604_vm6 = vcmask 130048  }
  0x22   :  { %v143_v41 = vsel %vm142_vm3, -1e+20, %v1763_v0  ;;  %s1773_s16 = smov 48   ;;  %s1774_s17 = smov 40   ;;  %vm606_vm7 = vcmask 195584   ;;  %vm1283_vm8 = vcmask 523264  }
  0x23   :  { %v148_v42 = vrot.slane %v143_v41, %v147_v40  ;;  %s1775_s20 = smov 8   ;;  %s1776_s1 = smov 24  }
  0x24   :  { %1475 = vmatpush3.bf16.msra.mxu0 %v1642_v2  ;;  %v609_v2 = vsel %vm608_vm4, -1e+20, %v1763_v0 }
  0x25   :  { %1486 = vmatprep.subr.bf16.mxu0 %v1763_v0 }
  0x27   :  { %1477 = vmatmul.mubr.msk.bf16.vlgmr.msra.gmra.mxu0 %vm96_vm1, %v72_v5 }
  0x28   :  { %1488 = vmatprep.mubr.msk.bf16.mxu0 %vm1764_vm0, %v1763_v0 }
  0xe7   :  { %v134_v6 = vpop.f32.mrf.mxu0 }
  0xe8   :  { %v135_v10 = vadd.f32 %v1388_v7, %v134_v6 }
  0xe9   :  { %v1478_v8 = vpop.f32.mrf.mxu0 }
  0xeb   :  { %v137_v9 = vpop.f32.mrf.mxu0 }
  0xec   :  { %v138_v11 = vadd.f32 %v1388_v7, %v137_v9  ;;  %v614_v7 = vrot.slane %v609_v2, %v147_v40 }
  0xed   :  { %v1479_v12 = vpop.f32.mrf.mxu0 }
  0xee   :  { %v1871_v13 = vpack.c.bf16 %v138_v11, %v135_v10 }
  0xf0   :  { %261 = vrot.lane.b32.xlu1 %v1871_v13, %s1765_s0  ;;  %151 = vrot.lane.b32.xlu0 %v1871_v13, %s1766_s30  ;;  %v1880_v14 = vrot.slane %v1871_v13, 4 }
  0xf4   :  { %373 = vrot.lane.b32.xlu1 %v1871_v13, %s1767_s10  ;;  %263 = vrot.lane.b32.xlu0 %v1871_v13, %s1768_s11 }
  0xf8   :  { %483 = vrot.lane.b32.xlu1 %v1871_v13, %s1769_s3  ;;  %371 = vrot.lane.b32.xlu0 %v1871_v13, %s1770_s13 }
  0xfc   :  { %481 = vrot.lane.b32.xlu0 %v1871_v13, %s1771_s14  ;;  %617 = vrot.lane.b32.xlu1 %v1880_v14, %s1766_s30 }
 0x100   :  { %727 = vrot.lane.b32.xlu0 %v1880_v14, %s1768_s11  ;;  %725 = vrot.lane.b32.xlu1 %v1880_v14, %s1765_s0 }
 0x104   :  { %837 = vrot.lane.b32.xlu0 %v1880_v14, %s1767_s10  ;;  %835 = vrot.lane.b32.xlu1 %v1880_v14, %s1770_s13 }
 0x108   :  { %947 = vrot.lane.b32.xlu0 %v1880_v14, %s1769_s3  ;;  %945 = vrot.lane.b32.xlu1 %v1880_v14, %s1771_s14 }
 0x162   :  { %v152_v15 = vpop.permute.xlu0 %151  ;;  %v262_v18 = vpop.permute.xlu1 %261 }
 0x163   :  { %v158_v16 = vsel %vm153_vm2, %v152_v15, 0 }
 0x164   :  { %1481 = vmatpush3.bf16.xpose.msra.mxu1 %v158_v16 }
 0x165   :  { %1492 = vmatprep.subr.bf16.mxu1 %v1763_v0 }
 0x166   :  { %v264_v17 = vpop.permute.xlu0 %263  ;;  %v374_v20 = vpop.permute.xlu1 %373 }
 0x167   :  { %v269_v19 = vsel %vm153_vm2, %v264_v17, 0  ;;  %v379_v21 = vsel %vm153_vm2, %v374_v20, 0 }
 0x16a   :  { %v484_v22 = vpop.permute.xlu1 %483  ;;  %v372_v23 = vpop.permute.xlu0 %371 }
 0x16b   :  { %1483 = vmatmul.mubr.msk.bf16.vlgmr.msra.gmra.mxu1 %vm153_vm2, %v1871_v13  ;;  %v489_v24 = vsel %vm153_vm2, %v484_v22, 0 }
 0x16c   :  { %1493 = vmatpush3.bf16.xpose.msra.mxu1 %v269_v19  ;;  %1494 = vmatprep.mubr.msk.bf16.mxu1 %vm1764_vm0, %v1763_v0 }
 0x16d   :  { %1504 = vmatprep.subr.bf16.mxu1 %v1763_v0 }
 0x16e   :  { %v618_v25 = vpop.permute.xlu1 %617  ;;  %v482_v26 = vpop.permute.xlu0 %481 }
 0x16f   :  { %v623_v27 = vsel %vm153_vm2, %v618_v25, 0 }
 0x172   :  { %v728_v28 = vpop.permute.xlu0 %727  ;;  %v726_v31 = vpop.permute.xlu1 %725 }
 0x173   :  { %1495 = vmatmul.mubr.msk.bf16.vlgmr.msra.gmra.mxu1 %vm153_vm2, %v262_v18  ;;  %v733_v29 = vsel %vm153_vm2, %v728_v28, 0 }
 0x174   :  { %1505 = vmatpush3.bf16.xpose.msra.mxu1 %v379_v21  ;;  %1506 = vmatprep.mubr.msk.bf16.mxu1 %vm1764_vm0, %v1763_v0 }
 0x175   :  { %1516 = vmatprep.subr.bf16.mxu1 %v1763_v0 }
 0x176   :  { %v838_v30 = vpop.permute.xlu0 %837  ;;  %v836_v34 = vpop.permute.xlu1 %835 }
 0x177   :  { %v843_v32 = vsel %vm153_vm2, %v838_v30, 0 }
 0x17a   :  { %v948_v33 = vpop.permute.xlu0 %947  ;;  %v946_v36 = vpop.permute.xlu1 %945 }
 0x17b   :  { %1507 = vmatmul.mubr.msk.bf16.vlgmr.msra.gmra.mxu1 %vm153_vm2, %v372_v23  ;;  %v953_v35 = vsel %vm153_vm2, %v948_v33, 0 }
 0x17c   :  { %1517 = vmatpush3.bf16.xpose.msra.mxu1 %v489_v24  ;;  %1518 = vmatprep.mubr.msk.bf16.mxu1 %vm1764_vm0, %v1763_v0 }
 0x17d   :  { %1528 = vmatprep.subr.bf16.mxu1 %v1763_v0 }
 0x183   :  { %1519 = vmatmul.mubr.msk.bf16.vlgmr.msra.gmra.mxu1 %vm153_vm2, %v482_v26 }
 0x184   :  { %1529 = vmatpush3.bf16.xpose.msra.mxu1 %v623_v27  ;;  %1530 = vmatprep.mubr.msk.bf16.mxu1 %vm1764_vm0, %v1763_v0 }
 0x185   :  { %1540 = vmatprep.subr.bf16.mxu1 %v1763_v0 }
 0x18b   :  { %1531 = vmatmul.mubr.msk.bf16.vlgmr.msra.gmra.mxu1 %vm153_vm2, %v1880_v14 }
 0x18c   :  { %1541 = vmatpush3.bf16.xpose.msra.mxu1 %v733_v29  ;;  %1542 = vmatprep.mubr.msk.bf16.mxu1 %vm1764_vm0, %v1763_v0 }
 0x18d   :  { %1552 = vmatprep.subr.bf16.mxu1 %v1763_v0 }
 0x193   :  { %1543 = vmatmul.mubr.msk.bf16.vlgmr.msra.gmra.mxu1 %vm153_vm2, %v726_v31 }
 0x194   :  { %1553 = vmatpush3.bf16.xpose.msra.mxu1 %v843_v32  ;;  %1554 = vmatprep.mubr.msk.bf16.mxu1 %vm1764_vm0, %v1763_v0 }
 0x195   :  { %1564 = vmatprep.subr.bf16.mxu1 %v1763_v0 }
 0x19b   :  { %1555 = vmatmul.mubr.msk.bf16.vlgmr.msra.gmra.mxu1 %vm153_vm2, %v836_v34 }
 0x19c   :  { %1565 = vmatpush3.bf16.xpose.msra.mxu1 %v953_v35  ;;  %1566 = vmatprep.mubr.msk.bf16.mxu1 %vm1764_vm0, %v1763_v0 }
 0x19d   :  { %1576 = vmatprep.subr.bf16.mxu1 %v1763_v0 }
 0x1a3   :  { %1567 = vmatmul.mubr.msk.bf16.vlgmr.msra.gmra.mxu1 %vm153_vm2, %v946_v36 }
 0x1a4   :  { %1580 = vmatprep.mubr.msk.bf16.mxu1 %vm1764_vm0, %v1763_v0 }
 0x22b   :  { %v194_v43 = vpop.f32.mrf.mxu1 }
 0x22c   :  { %v1933_v44 = vadd.f32 %v194_v43, %v148_v42 }
 0x22d   :  { %v1484_v45 = vpop.f32.mrf.mxu1 }
 0x22e   :  { %v200_v46 = vsel %vm153_vm2, %v1933_v44, -inf }
 0x22f   :  { %v197_v47 = vpop.f32.mrf.mxu1  ;;  %201 = vmax.xlane.f32.xlu0 %v200_v46 }
 0x231   :  { %v1485_v48 = vpop.f32.mrf.mxu1 }
 0x233   :  { %v305_v49 = vpop.f32.mrf.mxu1 }
 0x234   :  { %v306_v50 = vadd.f32 %v305_v49, %v148_v42 }
 0x235   :  { %v1496_v51 = vpop.f32.mrf.mxu1 }
 0x236   :  { %v311_v52 = vsel %vm153_vm2, %v306_v50, -inf }
 0x237   :  { %v308_v53 = vpop.f32.mrf.mxu1  ;;  %312 = vmax.xlane.f32.xlu1 %v311_v52 }
 0x239   :  { %v1497_v54 = vpop.f32.mrf.mxu1 }
 0x23b   :  { %v415_v55 = vpop.f32.mrf.mxu1 }
 0x23c   :  { %v416_v56 = vadd.f32 %v415_v55, %v148_v42 }
 0x23d   :  { %v1508_v57 = vpop.f32.mrf.mxu1 }
 0x23e   :  { %v421_v58 = vsel %vm153_vm2, %v416_v56, -inf }
 0x23f   :  { %v418_v59 = vpop.f32.mrf.mxu1  ;;  %422 = vmax.xlane.f32.xlu0 %v421_v58 }
 0x241   :  { %v1509_v61 = vpop.f32.mrf.mxu1 }
 0x243   :  { %v525_v62 = vpop.f32.mrf.mxu1 }
 0x244   :  { %v1939_v63 = vadd.f32 %v525_v62, %v148_v42 }
 0x245   :  { %v1520_v1 = vpop.f32.mrf.mxu1 }
 0x246   :  { %v531_v5 = vsel %vm153_vm2, %v1939_v63, -inf }
 0x247   :  { %v528_v6 = vpop.f32.mrf.mxu1  ;;  %532 = vmax.xlane.f32.xlu0 %v531_v5 }
 0x249   :  { %v1521_v8 = vpop.f32.mrf.mxu1 }
 0x24b   :  { %v659_v9 = vpop.f32.mrf.mxu1 }
 0x24c   :  { %v1944_v10 = vadd.f32 %v659_v9, %v614_v7 }
 0x24d   :  { %v1532_v11 = vpop.f32.mrf.mxu1 }
 0x24e   :  { %v665_v12 = vsel %vm153_vm2, %v1944_v10, -inf }
 0x24f   :  { %666 = vmax.xlane.f32.xlu1 %v665_v12  ;;  %v662_v15 = vpop.f32.mrf.mxu1 }
 0x251   :  { %v1533_v16 = vpop.f32.mrf.mxu1 }
 0x253   :  { %v769_v17 = vpop.f32.mrf.mxu1 }
 0x254   :  { %v1948_v18 = vadd.f32 %v769_v17, %v614_v7 }
 0x255   :  { %v1544_v19 = vpop.f32.mrf.mxu1 }
 0x256   :  { %v775_v20 = vsel %vm153_vm2, %v1948_v18, -inf }
 0x257   :  { %776 = vmax.xlane.f32.xlu0 %v775_v20  ;;  %v772_v21 = vpop.f32.mrf.mxu1 }
 0x259   :  { %v1545_v22 = vpop.f32.mrf.mxu1 }
 0x25b   :  { %v879_v23 = vpop.f32.mrf.mxu1 }
 0x25c   :  { %v880_v24 = vadd.f32 %v879_v23, %v614_v7 }
 0x25d   :  { %v1556_v25 = vpop.f32.mrf.mxu1 }
 0x25e   :  { %v885_v26 = vsel %vm153_vm2, %v880_v24, -inf }
 0x25f   :  { %886 = vmax.xlane.f32.xlu1 %v885_v26  ;;  %v882_v27 = vpop.f32.mrf.mxu1 }
 0x261   :  { %v1557_v28 = vpop.f32.mrf.mxu1 }
 0x263   :  { %v989_v29 = vpop.f32.mrf.mxu1 }
 0x264   :  { %v1957_v33 = vadd.f32 %v989_v29, %v614_v7 }
 0x265   :  { %v1568_v30 = vpop.f32.mrf.mxu1 }
 0x266   :  { %v995_v34 = vsel %vm153_vm2, %v1957_v33, -inf }
 0x267   :  { %v992_v31 = vpop.f32.mrf.mxu1 }
 0x269   :  { %v1569_v32 = vpop.f32.mrf.mxu1 }
 0x26d   :  { %323 = vrot.lane.b32.xlu0 %v1871_v13, %s1772_s15 }
 0x270   :  { %212 = vrot.lane.b32.xlu1 %v1871_v13, %s1761_s19 }
 0x28c   :  { %996 = vmax.xlane.f32.xlu0 %v995_v34 }
 0x2b8   :  { %v202_v35 = vpop.xlane.xlu0 %201 }
 0x2b9   :  { %v203_v36 = vsub.f32 %v1933_v44, %v202_v35 }
 0x2bb   :  { %v204_v37 = vmul.f32 1.442695, %v203_v36 }
 0x2bd   :  { %1651 = vpow2.f32 %v204_v37 }
 0x2c0   :  { %v313_v38 = vpop.xlane.xlu1 %312 }
 0x2c1   :  { %v314_v39 = vsub.f32 %v306_v50, %v313_v38 }
 0x2c3   :  { %v315_v40 = vmul.f32 1.442695, %v314_v39 }
 0x2c5   :  { %1653 = vpow2.f32 %v315_v40 }
 0x2c8   :  { %v423_v41 = vpop.xlane.xlu0 %422 }
 0x2c9   :  { %v424_v42 = vsub.f32 %v416_v56, %v423_v41 }
 0x2ca   :  { %v1962_v43 = vpop.eup %1651 }
 0x2cb   :  { %v425_v45 = vmul.f32 1.442695, %v424_v42  ;;  %v206_v46 = vsel %vm153_vm2, %v1962_v43, 0.0 }
 0x2cc   :  { %207 = vadd.xlane.f32.xlu1 %v206_v46 }
 0x2cd   :  { %1655 = vpow2.f32 %v425_v45 }
 0x2d0   :  { %v533_v53 = vpop.xlane.xlu0 %532 }
 0x2d1   :  { %v534_v55 = vsub.f32 %v1939_v63, %v533_v53 }
 0x2d2   :  { %v1966_v47 = vpop.eup %1653 }
 0x2d3   :  { %v317_v44 = vsel %vm153_vm2, %v1966_v47, 0.0  ;;  %v535_v56 = vmul.f32 1.442695, %v534_v55 }
 0x2d4   :  { %318 = vadd.xlane.f32.xlu0 %v317_v44 }
 0x2d5   :  { %1657 = vpow2.f32 %v535_v56 }
 0x2d8   :  { %v667_v50 = vpop.xlane.xlu1 %666 }
 0x2d9   :  { %v668_v57 = vsub.f32 %v1944_v10, %v667_v50 }
 0x2da   :  { %v1970_v48 = vpop.eup %1655 }
 0x2db   :  { %v427_v49 = vsel %vm153_vm2, %v1970_v48, 0.0  ;;  %v669_v60 = vmul.f32 1.442695, %v668_v57 }
 0x2dc   :  { %428 = vadd.xlane.f32.xlu1 %v427_v49 }
 0x2dd   :  { %1659 = vpow2.f32 %v669_v60 }
 0x2e0   :  { %v777_v58 = vpop.xlane.xlu0 %776 }
 0x2e1   :  { %v778_v59 = vsub.f32 %v1948_v18, %v777_v58 }
 0x2e3   :  { %v779_v62 = vmul.f32 1.442695, %v778_v59 }
 0x2e4   :  { %v324_v10 = vpop.permute.xlu0 %323 }
 0x2e5   :  { %1661 = vpow2.f32 %v779_v62 }
 0x2e8   :  { %v887_v51 = vpop.xlane.xlu1 %886 }
 0x2e9   :  { %v888_v61 = vsub.f32 %v880_v24, %v887_v51  ;;  %v329_v24 = vsel %vm217_vm5, %v324_v10, 0 }
 0x2ea   :  { %433 = vrot.lane.b32.xlu0 %v1871_v13, %s1773_s16 }
 0x2eb   :  { %v889_v1 = vmul.f32 1.442695, %v888_v61 }
 0x2ec   :  { %v213_v52 = vpop.permute.xlu1 %212 }
 0x2ed   :  { %v219_v54 = vsel %vm217_vm5, %v213_v52, 0  ;;  %543 = vrot.lane.b32.xlu1 %v1871_v13, %s1774_s17  ;;  %1663 = vpow2.f32 %v889_v1  ;;  %v1658_v13 = vpop.eup %1657 }
 0x2ee   :  { %1487 = vmatpush3.bf16.msra.mxu0 %v219_v54  ;;  %v537_v2 = vsel %vm153_vm2, %v1658_v13, 0.0  ;;  %v1984_v5 = vpop.eup %1659 }
 0x2ef   :  { %1498 = vmatprep.subr.bf16.mxu0 %v1763_v0  ;;  %v671_v6 = vsel %vm153_vm2, %v1984_v5, 0.0 }
 0x2f2   :  { %v1986_v63 = vpop.eup %1661 }
 0x2f3   :  { %v781_v8 = vsel %vm153_vm2, %v1986_v63, 0.0 }
 0x2fa   :  { %v1990_v7 = vpop.eup %1663 }
 0x2fb   :  { %v891_v9 = vsel %vm153_vm2, %v1990_v7, 0.0 }
 0x309   :  { %538 = vadd.xlane.f32.xlu0 %v537_v2 }
 0x30d   :  { %672 = vadd.xlane.f32.xlu0 %v671_v6 }
 0x311   :  { %782 = vadd.xlane.f32.xlu1 %v781_v8  ;;  %892 = vadd.xlane.f32.xlu0 %v891_v9 }
 0x315   :  { %v997_v11 = vpop.xlane.xlu0 %996 }
 0x316   :  { %v998_v12 = vsub.f32 %v1957_v33, %v997_v11 }
 0x318   :  { %v999_v15 = vmul.f32 1.442695, %v998_v12 }
 0x31a   :  { %1665 = vpow2.f32 %v999_v15 }
 0x322   :  { %787 = vrot.lane.b32.xlu1 %v1880_v14, %s1772_s15 }
 0x326   :  { %897 = vrot.lane.b32.xlu1 %v1880_v14, %s1773_s16 }
 0x327   :  { %v2001_v16 = vpop.eup %1665 }
 0x328   :  { %v1001_v17 = vsel %vm153_vm2, %v2001_v16, 0.0 }
 0x329   :  { %1002 = vadd.xlane.f32.xlu0 %v1001_v17 }
 0x32a   :  { %1007 = vrot.lane.b32.xlu1 %v1880_v14, %s1774_s17  ;;  %s1777_s17 = smov [#allocation7]  }
 0x32b   :  { %s1375_s18 = sshll.u32 %s1777_s17, 4  ;;  %s1376_s18 = int_to_ptr.vmem [resolvable:$true] %s1375_s18 }
 0x32c   :  { %p1736_p11 = scmp.lt.s32.totalorder %s1376_s18, %s1376_s18 }
 0x33f   :  { %677 = vrot.lane.b32.xlu0 %v1880_v14, %s1761_s19  ;;  %s1731_s19 = scalar_lea.vmem %s1376_s18, 256 }
 0x340   :  { %p1732_p10 = scmp.ne.s32.totalorder %s1376_s18, %s1731_s19  ;;  %p1737_p12 = scmp.lt.s32.totalorder %s1731_s19, %s1731_s19 }
 0x342   :  { %p1738_p13 = por %p1737_p12, %p1736_p11 }
 0x344   :  { %p1739_p0 = pnand %p1738_p13, %p1732_p10 }
 0x355   :  { %v208_v18 = vpop.xlane.xlu1 %207 }
 0x356   :  { %1667 = vrcp.f32 %v208_v18 }
 0x35d   :  { %v319_v19 = vpop.xlane.xlu0 %318 }
 0x35e   :  { %1669 = vrcp.f32 %v319_v19 }
 0x361   :  { %v434_v26 = vpop.permute.xlu0 %433 }
 0x362   :  { %v439_v28 = vsel %vm217_vm5, %v434_v26, 0 }
 0x363   :  { %v1668_v20 = vpop.eup %1667 }
 0x364   :  { %v210_v21 = vmul.f32 %v1668_v20, %v1962_v43 }
 0x365   :  { %v429_v22 = vpop.xlane.xlu1 %428 }
 0x366   :  { %1671 = vrcp.f32 %v429_v22  ;;  %v211_v23 = vpack.c.bf16 %v210_v21, %v210_v21 }
 0x368   :  { %1489 = vmatmul.mubr.msk.bf16.vlgmr.msra.gmra.mxu0 %vm153_vm2, %v211_v23  ;;  %v1643_v23 = vld [vmem:[%s2127_s4 + $0x8] sm:$0xff]  }
 0x369   :  { %1499 = vmatpush3.bf16.msra.mxu0 %v329_v24  ;;  %1500 = vmatprep.mubr.msk.bf16.mxu0 %vm1764_vm0, %v1763_v0  ;;  %v544_v31 = vpop.permute.xlu1 %543 }
 0x36a   :  { %1510 = vmatprep.subr.bf16.mxu0 %v1763_v0  ;;  %v549_v33 = vsel %vm217_vm5, %v544_v31, 0  ;;  %1577 = vmatpush3.bf16.msra.mxu1 %v1643_v23 }
 0x36b   :  { %v1670_v14 = vpop.eup %1669  ;;  %1578 = vmatprep.subr.bf16.mxu1 %v1763_v0 }
 0x36c   :  { %v321_v25 = vmul.f32 %v1670_v14, %v1966_v47 }
 0x36e   :  { %v322_v27 = vpack.c.bf16 %v321_v25, %v321_v25 }
 0x370   :  { %1501 = vmatmul.mubr.msk.bf16.vlgmr.msra.gmra.mxu0 %vm153_vm2, %v322_v27  ;;  %v1644_v27 = vld [vmem:[%s2127_s4] sm:$0xff]  }
 0x371   :  { %1511 = vmatpush3.bf16.msra.mxu0 %v439_v28  ;;  %1512 = vmatprep.mubr.msk.bf16.mxu0 %vm1764_vm0, %v1763_v0 }
 0x372   :  { %1522 = vmatprep.subr.bf16.mxu0 %v1763_v0  ;;  %1579 = vmatpush3.bf16.msra.mxu1 %v1644_v27  ;;  %v1413_v27 = vld [vmem:[%s2131_s8 + $0x2] ss:$0 sm:$0xff] }
 0x373   :  { %v1672_v29 = vpop.eup %1671  ;;  %1592 = vmatprep.subr.bf16.mxu1 %v1763_v0 }
 0x374   :  { %v431_v30 = vmul.f32 %v1672_v29, %v1970_v48 }
 0x376   :  { %v432_v32 = vpack.c.bf16 %v431_v30, %v431_v30 }
 0x378   :  { %1513 = vmatmul.mubr.msk.bf16.vlgmr.msra.gmra.mxu0 %vm153_vm2, %v432_v32 }
 0x379   :  { %1523 = vmatpush3.bf16.msra.mxu0 %v549_v33  ;;  %1524 = vmatprep.mubr.msk.bf16.mxu0 %vm1764_vm0, %v1763_v0 }
 0x37a   :  { %1534 = vmatprep.subr.bf16.mxu0 %v1763_v0 }
 0x392   :  { %v539_v34 = vpop.xlane.xlu0 %538 }
 0x393   :  { %1673 = vrcp.f32 %v539_v34 }
 0x396   :  { %v673_v37 = vpop.xlane.xlu0 %672 }
 0x397   :  { %1675 = vrcp.f32 %v673_v37 }
 0x39a   :  { %v783_v39 = vpop.xlane.xlu1 %782  ;;  %v893_v40 = vpop.xlane.xlu0 %892 }
 0x39b   :  { %1677 = vrcp.f32 %v783_v39 }
 0x39c   :  { %1679 = vrcp.f32 %v893_v40 }
 0x39e   :  { %v788_v47 = vpop.permute.xlu1 %787 }
 0x39f   :  { %v793_v49 = vsel %vm217_vm5, %v788_v47, 0 }
 0x3a0   :  { %v1674_v35 = vpop.eup %1673 }
 0x3a1   :  { %v541_v36 = vmul.f32 %v1674_v35, %v1658_v13 }
 0x3a2   :  { %v898_v51 = vpop.permute.xlu1 %897 }
 0x3a3   :  { %v542_v38 = vpack.c.bf16 %v541_v36, %v541_v36  ;;  %v903_v54 = vsel %vm217_vm5, %v898_v51, 0 }
 0x3a4   :  { %v1676_v41 = vpop.eup %1675 }
 0x3a5   :  { %1525 = vmatmul.mubr.msk.bf16.vlgmr.msra.gmra.mxu0 %vm153_vm2, %v542_v38  ;;  %v675_v43 = vmul.f32 %v1676_v41, %v1984_v5 }
 0x3a6   :  { %1536 = vmatprep.mubr.msk.bf16.mxu0 %vm1764_vm0, %v1763_v0  ;;  %v1008_v56 = vpop.permute.xlu1 %1007 }
 0x3a7   :  { %v676_v44 = vpack.c.bf16 %v675_v43, %v675_v43  ;;  %v1013_v59 = vsel %vm217_vm5, %v1008_v56, 0 }
 0x3a8   :  { %v1678_v48 = vpop.eup %1677 }
 0x3a9   :  { %v785_v50 = vmul.f32 %v1678_v48, %v1986_v63  ;;  %v1680_v53 = vpop.eup %1679 }
 0x3aa   :  { %v895_v55 = vmul.f32 %v1680_v53, %v1990_v7 }
 0x3ab   :  { %v786_v52 = vpack.c.bf16 %v785_v50, %v785_v50 }
 0x3ac   :  { %v896_v57 = vpack.c.bf16 %v895_v55, %v895_v55 }
 0x3b2   :  { %v1003_v42 = vpop.xlane.xlu0 %1002 }
 0x3b3   :  { %1681 = vrcp.f32 %v1003_v42 }
 0x3b6   :  { %v678_v45 = vpop.permute.xlu0 %677 }
 0x3b7   :  { %v683_v46 = vsel %vm217_vm5, %v678_v45, 0 }
 0x3b8   :  { %1535 = vmatpush3.bf16.msra.mxu0 %v683_v46 }
 0x3b9   :  { %1546 = vmatprep.subr.bf16.mxu0 %v1763_v0 }
 0x3bb   :  { %1537 = vmatmul.mubr.msk.bf16.vlgmr.msra.gmra.mxu0 %vm153_vm2, %v676_v44 }
 0x3bc   :  { %1547 = vmatpush3.bf16.msra.mxu0 %v793_v49  ;;  %1548 = vmatprep.mubr.msk.bf16.mxu0 %vm1764_vm0, %v1763_v0 }
 0x3bd   :  { %1558 = vmatprep.subr.bf16.mxu0 %v1763_v0 }
 0x3c0   :  { %v1682_v58 = vpop.eup %1681 }
 0x3c1   :  { %v1005_v60 = vmul.f32 %v1682_v58, %v2001_v16 }
 0x3c3   :  { %1549 = vmatmul.mubr.msk.bf16.vlgmr.msra.gmra.mxu0 %vm153_vm2, %v786_v52  ;;  %v1006_v61 = vpack.c.bf16 %v1005_v60, %v1005_v60 }
 0x3c4   :  { %1559 = vmatpush3.bf16.msra.mxu0 %v903_v54  ;;  %1560 = vmatprep.mubr.msk.bf16.mxu0 %vm1764_vm0, %v1763_v0  ;;  %v1408_v54 = vld [vmem:[%s2131_s8] ss:$0 sm:$0xff] }
 0x3c5   :  { %1570 = vmatprep.subr.bf16.mxu0 %v1763_v0 }
 0x3cb   :  { %1561 = vmatmul.mubr.msk.bf16.vlgmr.msra.gmra.mxu0 %vm153_vm2, %v896_v57 }
 0x3cc   :  { %1571 = vmatpush3.bf16.msra.mxu0 %v1013_v59  ;;  %1572 = vmatprep.mubr.msk.bf16.mxu0 %vm1764_vm0, %v1763_v0 }
 0x3cd   :  { %1584 = vmatprep.subr.bf16.mxu0 %v1763_v0 }
 0x3d3   :  { %1573 = vmatmul.mubr.msk.bf16.vlgmr.msra.gmra.mxu0 %vm153_vm2, %v1006_v61 }
 0x3d4   :  { %1588 = vmatprep.mubr.msk.bf16.mxu0 %vm1764_vm0, %v1763_v0 }
 0x428   :  { %v255_v62 = vpop.f32.mrf.mxu0 }
 0x42a   :  { %v1490_v1 = vpop.f32.mrf.mxu0 }
 0x42c   :  { %v258_v13 = vpop.f32.mrf.mxu0 }
 0x42e   :  { %v1491_v2 = vpop.f32.mrf.mxu0 }
 0x430   :  { %v365_v5 = vpop.f32.mrf.mxu0 }
 0x432   :  { %v1502_v63 = vpop.f32.mrf.mxu0 }
 0x434   :  { %v368_v6 = vpop.f32.mrf.mxu0 }
 0x436   :  { %v1503_v7 = vpop.f32.mrf.mxu0 }
 0x438   :  { %v475_v8 = vpop.f32.mrf.mxu0 }
 0x43a   :  { %v1514_v9 = vpop.f32.mrf.mxu0 }
 0x43c   :  { %v478_v10 = vpop.f32.mrf.mxu0 }
 0x43e   :  { %v1515_v11 = vpop.f32.mrf.mxu0 }
 0x465   :  { %v585_v12 = vpop.f32.mrf.mxu0 }
 0x467   :  { %v1526_v15 = vpop.f32.mrf.mxu0 }
 0x468   :  { %v1647_v15 = vld [vmem:[%s2130_s7 + $0x18] sm:$0xff]  }
 0x469   :  { %v588_v16 = vpop.f32.mrf.mxu0 }
 0x46b   :  { %v1527_v17 = vpop.f32.mrf.mxu0 }
 0x47b   :  { %v719_v18 = vpop.f32.mrf.mxu0 }
 0x47d   :  { %v1538_v19 = vpop.f32.mrf.mxu0 }
 0x47f   :  { %v722_v20 = vpop.f32.mrf.mxu0 }
 0x481   :  { %v1539_v21 = vpop.f32.mrf.mxu0 }
 0x483   :  { %v829_v22 = vpop.f32.mrf.mxu0 }
 0x484   :  { %v1626_v24 = vpack.i.bf16 %v829_v22, %v365_v5 }
 0x485   :  { %v1550_v14 = vpop.f32.mrf.mxu0 }
 0x486   :  { %1627 = vrot.lane.b32.xlu1 %v1626_v24, %s1775_s20  ;;  %v1412_v24 = vld [vmem:[%s2131_s8 + $0x1] ss:$0 sm:$0xff] }
 0x487   :  { %v832_v25 = vpop.f32.mrf.mxu0 }
 0x489   :  { %v1551_v26 = vpop.f32.mrf.mxu0 }
 0x48b   :  { %v939_v28 = vpop.f32.mrf.mxu0 }
 0x48c   :  { %v1631_v29 = vpack.i.bf16 %v939_v28, %v475_v8 }
 0x48d   :  { %v1562_v30 = vpop.f32.mrf.mxu0 }
 0x48e   :  { %1632 = vrot.lane.b32.xlu1 %v1631_v29, %s1758_s12 }
 0x48f   :  { %v942_v31 = vpop.f32.mrf.mxu0 }
 0x491   :  { %v1563_v32 = vpop.f32.mrf.mxu0 }
 0x492   :  { %v1648_v32 = vld [vmem:[%s2130_s7 + $0x10] sm:$0xff]  }
 0x493   :  { %v1049_v33 = vpop.f32.mrf.mxu0 }
 0x494   :  { %v1636_v34 = vpack.i.bf16 %v1049_v33, %v585_v12  ;;  %v1645_v12 = vld [vmem:[#allocation5 + $0x8] sm:$0xff]  }
 0x495   :  { %v1574_v35 = vpop.f32.mrf.mxu0  ;;  %1585 = vmatpush3.bf16.msra.mxu0 %v1645_v12  ;;  %v1649_v33 = vld [vmem:[%s2130_s7 + $0x8] sm:$0xff]  }
 0x496   :  { %1637 = vrot.lane.b32.xlu0 %v1636_v34, %s1776_s1  ;;  %1586 = vmatprep.subr.bf16.mxu0 %v1763_v0  ;;  %v1650_v34 = vld [vmem:[%s2130_s7] sm:$0xff]  }
 0x497   :  { %v1052_v36 = vpop.f32.mrf.mxu0  ;;  %v1414_v35 = vld [vmem:[%s2129_s6] ss:$0 sm:$0xff] }
 0x499   :  { %v1575_v37 = vpop.f32.mrf.mxu0 }
 0x4f8   :  { %v1628_v38 = vpop.permute.xlu1 %1627 }
 0x4f9   :  { %v1630_v40 = vunpack.i.h.bf16 %v1628_v38  ;;  %v1629_v41 = vunpack.i.l.bf16 %v1628_v38 }
 0x4fb   :  { %v1067_v46 = vsel %vm153_vm2, %v719_v18, %v1630_v40  ;;  %v603_v47 = vsel %vm153_vm2, %v255_v62, %v1629_v41 }
 0x500   :  { %v1633_v39 = vpop.permute.xlu1 %1632 }
 0x501   :  { %v1635_v42 = vunpack.i.h.bf16 %v1633_v39  ;;  %v1634_v43 = vunpack.i.l.bf16 %v1633_v39 }
 0x503   :  { %v1068_v49 = vsel %vm604_vm6, %v1067_v46, %v1635_v42  ;;  %v605_v50 = vsel %vm604_vm6, %v603_v47, %v1634_v43 }
 0x508   :  { %v1638_v45 = vpop.permute.xlu0 %1637 }
 0x509   :  { %v1640_v44 = vunpack.i.h.bf16 %v1638_v45  ;;  %v1639_v48 = vunpack.i.l.bf16 %v1638_v45 }
 0x50b   :  { %v1069_v51 = vsel %vm606_vm7, %v1068_v49, %v1640_v44  ;;  %v607_v52 = vsel %vm606_vm7, %v605_v50, %v1639_v48 }
 0x50c   :  { %v1070_v53 = vpack.c.bf16 %v1069_v51, %v607_v52 }
 0x50e   :  { %1581 = vmatmul.mubr.msk.bf16.vlgmr.msra.gmra.mxu1 %vm96_vm1, %v1070_v53 }
 0x50f   :  { %1600 = vmatprep.mubr.msk.bf16.mxu1 %vm1764_vm0, %v1763_v0  ;;  %1593 = vmatpush3.bf16.msra.mxu1 %v1647_v15 }
 0x510   :  { %1594 = vmatprep.subr.bf16.mxu1 %v1763_v0 }
 0x513   :  { %1595 = vmatpush3.bf16.msra.mxu1 %v1648_v32 }
 0x514   :  { %1596 = vmatprep.subr.bf16.mxu1 %v1763_v0 }
 0x517   :  { %1597 = vmatpush3.bf16.msra.mxu1 %v1649_v33 }
 0x518   :  { %1598 = vmatprep.subr.bf16.mxu1 %v1763_v0  ;;  %v1418_v0 = vld [vmem:[%s2131_s8 + $0x5] ss:$0 sm:$0xff] }
 0x51b   :  { %1599 = vmatpush3.bf16.msra.mxu1 %v1650_v34 }
 0x5ce   :  { %v1128_v55 = vpop.f32.mrf.mxu1 }
 0x5cf   :  { %v1129_v56 = vadd.f32 %v1408_v54, %v1128_v55 }
 0x5d0   :  { %v1582_v57 = vpop.f32.mrf.mxu1 }
 0x5d1   :  { %v1135_v58 = vadd.f32 %v1129_v56, %v1854_v3 }
 0x5d2   :  { %v1131_v59 = vpop.f32.mrf.mxu1 }
 0x5d3   :  { %v1132_v60 = vadd.f32 %v1408_v54, %v1131_v59  ;;  %v1137_v61 = vsel %vm96_vm1, %v1135_v58, 0.0 }
 0x5d4   :  { %v1583_v62 = vpop.f32.mrf.mxu1  ;;  %1138 = vadd.xlane.f32.xlu1 %v1137_v61 }
 0x5d5   :  { %v1136_v1 = vadd.f32 %v1132_v60, %v1859_v4  ;;  %v1646_v4 = vld [vmem:[#allocation5] sm:$0xff]  }
 0x5d6   :  { %1587 = vmatpush3.bf16.msra.mxu0 %v1646_v4 }
 0x5d7   :  { %v1140_v13 = vsel %vm96_vm1, %v1136_v1, 0.0 }
 0x5d8   :  { %1141 = vadd.xlane.f32.xlu0 %v1140_v13 }
 0x65d   :  { %v1139_v2 = vpop.xlane.xlu1 %1138 }
 0x65e   :  { %v1144_v5 = vmul.f32 0.03125, %v1139_v2 }
 0x660   :  { %v1146_v63 = vsub.f32 %v1135_v58, %v1144_v5 }
 0x661   :  { %v1142_v6 = vpop.xlane.xlu0 %1141 }
 0x662   :  { %v1145_v7 = vmul.f32 0.03125, %v1142_v6  ;;  %v1148_v8 = vmul.f32 %v1146_v63, %v1146_v63 }
 0x664   :  { %v1147_v9 = vsub.f32 %v1136_v1, %v1145_v7  ;;  %v1150_v3 = vsel %vm96_vm1, %v1148_v8, 0.0 }
 0x665   :  { %1151 = vadd.xlane.f32.xlu0 %v1150_v3  ;;  %v1424_v3 = vld [vmem:[%s2131_s8 + $0x3] ss:$0 sm:$0xff] }
 0x666   :  { %v1149_v10 = vmul.f32 %v1147_v9, %v1147_v9 }
 0x668   :  { %v1153_v11 = vsel %vm96_vm1, %v1149_v10, 0.0 }
 0x669   :  { %1154 = vadd.xlane.f32.xlu1 %v1153_v11  ;;  %v1425_v11 = vld [vmem:[%s2131_s8 + $0x4] ss:$0 sm:$0xff] }
 0x6ee   :  { %v1152_v16 = vpop.xlane.xlu0 %1151 }
 0x6ef   :  { %v1156_v17 = vmul.f32 0.03125, %v1152_v16 }
 0x6f1   :  { %v1158_v18 = vadd.f32 1e-05, %v1156_v17 }
 0x6f2   :  { %v1155_v19 = vpop.xlane.xlu1 %1154 }
 0x6f3   :  { %1683 = vrsqrt.f32 %v1158_v18  ;;  %v1157_v20 = vmul.f32 0.03125, %v1155_v19 }
 0x6f5   :  { %v1159_v21 = vadd.f32 1e-05, %v1157_v20 }
 0x6f7   :  { %1685 = vrsqrt.f32 %v1159_v21 }
 0x700   :  { %v1684_v22 = vpop.eup %1683 }
 0x701   :  { %v1162_v23 = vmul.f32 %v1684_v22, %v1146_v63 }
 0x703   :  { %v1168_v26 = vmul.f32 %v1412_v24, %v1162_v23 }
 0x704   :  { %v1686_v14 = vpop.eup %1685 }
 0x705   :  { %v1163_v25 = vmul.f32 %v1686_v14, %v1147_v9  ;;  %v1174_v29 = vadd.f32 %v1413_v27, %v1168_v26 }
 0x707   :  { %v1169_v28 = vmul.f32 %v1412_v24, %v1163_v25 }
 0x709   :  { %v1175_v30 = vadd.f32 %v1413_v27, %v1169_v28 }
 0x70b   :  { %v1176_v31 = vpack.c.bf16 %v1175_v30, %v1174_v29 }
 0x70d   :  { %1589 = vmatmul.mubr.msk.bf16.vlgmr.msra.gmra.mxu0 %vm96_vm1, %v1176_v31 }
 0x7cd   :  { %v1237_v36 = vpop.f32.mrf.mxu0 }
 0x7ce   :  { %v1238_v38 = vadd.f32 %v1414_v35, %v1237_v36 }
 0x7cf   :  { %v1590_v37 = vpop.f32.mrf.mxu0 }
 0x7d0   :  { %v1244_v42 = vmax.f32 %v1238_v38, 0.0 }
 0x7d1   :  { %v1240_v39 = vpop.f32.mrf.mxu0 }
 0x7d2   :  { %v1241_v40 = vadd.f32 %v1414_v35, %v1240_v39 }
 0x7d3   :  { %v1591_v41 = vpop.f32.mrf.mxu0 }
 0x7d4   :  { %v1245_v43 = vmax.f32 %v1241_v40, 0.0 }
 0x7d6   :  { %v1246_v45 = vpack.c.bf16 %v1245_v43, %v1244_v42 }
 0x7d8   :  { %1601 = vmatmul.mubr.msk.bf16.vlgmr.msra.gmra.mxu1 %vm1283_vm8, %v1246_v45 }
 0x898   :  { %v1321_v46 = vpop.f32.mrf.mxu1 }
 0x899   :  { %v1322_v47 = vadd.f32 %v1418_v0, %v1321_v46 }
 0x89a   :  { %v1602_v44 = vpop.f32.mrf.mxu1 }
 0x89b   :  { %v1328_v48 = vadd.f32 %v1322_v47, %v1174_v29 }
 0x89c   :  { %v1324_v49 = vpop.f32.mrf.mxu1 }
 0x89d   :  { %v1325_v50 = vadd.f32 %v1418_v0, %v1324_v49  ;;  %v1330_v51 = vsel %vm96_vm1, %v1328_v48, 0.0 }
 0x89e   :  { %1331 = vadd.xlane.f32.xlu0 %v1330_v51  ;;  %v1603_v52 = vpop.f32.mrf.mxu1 }
 0x89f   :  { %v1329_v53 = vadd.f32 %v1325_v50, %v1175_v30 }
 0x8a1   :  { %v1333_v54 = vsel %vm96_vm1, %v1329_v53, 0.0 }
 0x8a2   :  { %1334 = vadd.xlane.f32.xlu1 %v1333_v54 }
 0x927   :  { %v1332_v55 = vpop.xlane.xlu0 %1331 }
 0x928   :  { %v1336_v56 = vmul.f32 0.03125, %v1332_v55 }
 0x92a   :  { %v1338_v57 = vsub.f32 %v1328_v48, %v1336_v56 }
 0x92b   :  { %v1335_v58 = vpop.xlane.xlu1 %1334 }
 0x92c   :  { %v1337_v59 = vmul.f32 0.03125, %v1335_v58  ;;  %v1340_v60 = vmul.f32 %v1338_v57, %v1338_v57 }
 0x92e   :  { %v1339_v61 = vsub.f32 %v1329_v53, %v1337_v59  ;;  %v1342_v62 = vsel %vm96_vm1, %v1340_v60, 0.0 }
 0x92f   :  { %1343 = vadd.xlane.f32.xlu0 %v1342_v62 }
 0x930   :  { %v1341_v1 = vmul.f32 %v1339_v61, %v1339_v61 }
 0x932   :  { %v1345_v13 = vsel %vm96_vm1, %v1341_v1, 0.0 }
 0x933   :  { %1346 = vadd.xlane.f32.xlu1 %v1345_v13 }
 0x9b8   :  { %v1344_v2 = vpop.xlane.xlu0 %1343 }
 0x9b9   :  { %v1348_v5 = vmul.f32 0.03125, %v1344_v2 }
 0x9bb   :  { %v1350_v63 = vadd.f32 1e-05, %v1348_v5 }
 0x9bc   :  { %v1347_v6 = vpop.xlane.xlu1 %1346 }
 0x9bd   :  { %1687 = vrsqrt.f32 %v1350_v63  ;;  %v1349_v7 = vmul.f32 0.03125, %v1347_v6 }
 0x9bf   :  { %v1351_v8 = vadd.f32 1e-05, %v1349_v7 }
 0x9c1   :  { %1689 = vrsqrt.f32 %v1351_v8 }
 0x9ca   :  { %v1688_v9 = vpop.eup %1687 }
 0x9cb   :  { %v1354_v10 = vmul.f32 %v1688_v9, %v1338_v57 }
 0x9cd   :  { %v1360_v12 = vmul.f32 %v1424_v3, %v1354_v10 }
 0x9ce   :  { %v1690_v4 = vpop.eup %1689 }
 0x9cf   :  { %v1355_v15 = vmul.f32 %v1690_v4, %v1339_v61  ;;  %v1366_v16 = vadd.f32 %v1425_v11, %v1360_v12 }
 0x9d1   :  { %v1361_v17 = vmul.f32 %v1424_v3, %v1355_v15  ;;  %1368 = vst.msk [vmem:[#allocation7] sm:$0xff] %vm96_vm1, %v1366_v16 }
 0x9d3   :  { %v1367_v18 = vadd.f32 %v1425_v11, %v1361_v17 }
 0x9d5   :  { %1369 = vst.msk [vmem:[#allocation7 + $0x8] sm:$0xff] %vm96_vm1, %v1367_v18 }
 0x9d6   :  { %1742 = shalt.err (!%p1739_p0)
}
 0x9d7   :  { %s1778_s8 = smov 128  }
 0x9d8   :  { %1381 = dma.vmem_to_hbm [thread:$0]  %s1376_s18, 256, %s2132_s9, [#allocation4], %s1778_s8, %s1778_s8, %s1775_s20  }
 0x9d9   :  { %1755 = dma.done.wait [#allocation4], 256  }
 0x9da   :  { %1756 = vsyncadd [#allocation4], 4294967040 }
 0x9db   :  { %1385 = vsyncpa [#allocation3], 1 }
 0x9dc   :  { %1386 = vsyncpa [#allocation6], 1 }
 0x9dd   :  { %1387 = vsyncpa [#allocation4], 1 }

</bundles_post_ra>
